<compile_context>
chip_gen: v5e
topology: v5e:2x2
jax: 0.10.0
libtpu: 0.0.40
codegen_flags: <defaults>
</compile_context>

<pallas_src>
import jax
import jax.numpy as jnp
from jax.experimental import pallas as pl
from jax.experimental.pallas import tpu as pltpu


# ---------------------------------------------------------------------------
# Kernels
# ---------------------------------------------------------------------------
def _gate_kernel(xg_ref, cw_ref, lw1_ref, lw2_ref, lw3_ref, gtot_ref):
    """Compute gtot = g1 * g2 * g3 (per-modality gates), once per call.

    xg_ref  : (M, GR, E) VMEM - first GR (>= M) batch rows of the stacked input
    cw_ref  : (3, M, M, E) VMEM - cw_ref[k, m, r, :] = stage-k Conv1d_r.weight[0, m, 0]
    lwK_ref : (M*E, E) VMEM - stage-K Linear weights, row i*E+o = Linear_i.weight[o, :]
    gtot_ref: (M, E) VMEM
    """
    M, E = gtot_ref.shape

    # Diagonal sub-block: cd[m, r, :] = cur_modality_m[batch_row=r, :] for r < M.
    cd = xg_ref[:, :M, :].astype(jnp.float32)                      # (M, M, E)

    # Identity mask over (modality, linear-block) used for diagonal extraction.
    row = jax.lax.broadcasted_iota(jnp.int32, (M, M, 1), 0)
    col = jax.lax.broadcasted_iota(jnp.int32, (M, M, 1), 1)
    eye = row == col                                               # (M, M, 1)

    gtot = None
    for k, lw_ref in enumerate((lw1_ref, lw2_ref, lw3_ref)):
        # 1x1 conv over modality channels, vectorized over (rows, lanes):
        #   conv[r, :] = sum_m cw_k[r, m] * cd[m, r, :]
        conv = jnp.sum(cw_ref[k] * cd, axis=0)                     # (M, E)
        # All M Linear(E, E) layers in ONE MXU matmul (transposed RHS):
        #   z_all[r, i*E + o] = conv[r] . Linear_i.weight[o, :]
        z_all = jax.lax.dot_general(
            conv, lw_ref[...],
            dimension_numbers=(((1,), (1,)), ((), ())),
            preferred_element_type=jnp.float32)                    # (M, M*E)
        # Diagonal E-wide blocks via masked reduce (no slice/concat shuffles).
        z3 = z_all.reshape(M, M, E)
        zdiag = jnp.sum(jnp.where(eye, z3, 0.0), axis=1)           # (M, E)
        g = jax.nn.sigmoid(zdiag)
        cd = cd * g[:, None, :]                                    # feeds next stage
        gtot = g if gtot is None else gtot * g

    gtot_ref[...] = gtot


def _apply_gate_kernel(x_ref, g_ref, out_ref):
    """HBM-bound stage: out[m, b, :] = x[m, b, :] * gtot[m, :]."""
    out_ref[...] = (x_ref[...] * g_ref[...][:, None, :]).astype(out_ref.dtype)


# ---------------------------------------------------------------------------
# Wrappers
# ---------------------------------------------------------------------------
def prepare_gated_block_params(cw1, lw1, cw2, lw2, cw3, lw3):
    """One-time parameter packing (do at init time, not per call).

    cwK: (M, M)    - cwK[i, m] = stage-K Conv1d_i.weight[0, m, 0]
    lwK: (M, E, E) - lwK[i]    = stage-K Linear_i.weight (out, in)
    """
    M, E = lw1.shape[0], lw1.shape[1]
    # (3, M, M) with [k, m, r] = cwK[r, m]; lane-broadcast once (24 KiB, no padded
    # trailing size-1 dim, no in-kernel broadcast).
    cw_t = jnp.stack([cw1.T, cw2.T, cw3.T], axis=0).astype(jnp.float32)
    cw_bcast = jnp.broadcast_to(cw_t[..., None], (3, M, M, E))
    # Free row-major reshapes (no HBM transpose): row i*E + o == Linear_i.weight[o].
    lw1f = lw1.reshape(M * E, E)
    lw2f = lw2.reshape(M * E, E)
    lw3f = lw3.reshape(M * E, E)
    return cw_bcast, lw1f, lw2f, lw3f


def gated_block_stacked(x, cw_bcast, lw1f, lw2f, lw3f, *, batch_tile=512):
    """Fused Gated_block on the stacked (M, B, E) slab. Returns (out, prevx=x)."""
    M, B, E = x.shape
    assert B >= M, "module quirk: batch index used as modality index needs B >= M"

    # --- 1) gate chain: tiny 1-step pallas_call, hoisted out of the batch grid ---
    GR = 8 if B >= 8 else B   # sublane-aligned window; only rows 0..M-1 are read
    gtot = pl.pallas_call(
        _gate_kernel,
        out_shape=jax.ShapeDtypeStruct((M, E), jnp.float32),
        grid=(1,),
        in_specs=[
            pl.BlockSpec((M, GR, E), lambda i: (0, 0, 0)),
            pl.BlockSpec((3, M, M, E), lambda i: (0, 0, 0, 0)),
            pl.BlockSpec((M * E, E), lambda i: (0, 0)),
            pl.BlockSpec((M * E, E), lambda i: (0, 0)),
            pl.BlockSpec((M * E, E), lambda i: (0, 0)),
        ],
        out_specs=pl.BlockSpec((M, E), lambda i: (0, 0)),
        compiler_params=pltpu.CompilerParams(
            dimension_semantics=("arbitrary",)),
    )(x, cw_bcast, lw1f, lw2f, lw3f)

    # --- 2) broadcast-multiply over the full batch, gridded over batch tiles ---
    # Bounded tile (cap 512 rows) + pl.cdiv grid with block padding: double-buffered
    # VMEM stays ~4 MiB on every TPU generation, no divisibility requirement.
    TB = B if B <= batch_tile else batch_tile
    grid = (pl.cdiv(B, TB),)

    cost = pl.CostEstimate(
        flops=int(M * B * E),
        transcendentals=0,
        bytes_accessed=int(4 * (2 * M * B * E + M * E)),
    )

    out = pl.pallas_call(
        _apply_gate_kernel,
        out_shape=jax.ShapeDtypeStruct((M, B, E), x.dtype),
        grid=grid,
        in_specs=[pl.BlockSpec((M, TB, E), lambda b: (0, b, 0)),
                  pl.BlockSpec((M, E), lambda b: (0, 0))],
        out_specs=pl.BlockSpec((M, TB, E), lambda b: (0, b, 0)),
        compiler_params=pltpu.CompilerParams(
            dimension_semantics=("parallel",)),   # dual-TC sharding on v7x
        cost_estimate=cost,
    )(x, gtot)
    return out, x


@jax.jit
def gated_block(x_list, cw1, lw1, cw2, lw2, cw3, lw3):
    """Mirrors Gated_block.forward on the PyTorch list-of-(B, 1, E) interface.

    List <-> slab conversion and the tiny parameter packing happen once at this
    model boundary; chained blocks should use gated_block_stacked on the slab.
    """
    M = len(x_list)
    B, C, E = x_list[0].shape
    assert C == 1, "each modality input must be (B, 1, E)"
    params = prepare_gated_block_params(cw1, lw1, cw2, lw2, cw3, lw3)
    x = jnp.stack([xi[:, 0, :] for xi in x_list], axis=0)            # (M, B, E)
    out, _ = gated_block_stacked(x, *params)
    out_block = [out[i][:, None, :] for i in range(M)]               # back to (B, 1, E)
    prevx = x_list                                                   # block1 returns x as prevx
    return out_block, prevx


# ---------------------------------------------------------------------------
# Pure-JAX reference (ground truth mirroring the PyTorch forward)
# ---------------------------------------------------------------------------
def reference(x_list, cws, lws):
    M = len(x_list)
    cur = [xi[:, 0, :] for xi in x_list]                             # (B, E)
    for cw, lw in zip(cws, lws):
        new = []
        for i in range(M):
            cat_i = jnp.stack([cur[m][i] for m in range(M)], axis=0)  # (M, E)
            conv_i = cw[i] @ cat_i                                    # (E,)
            z = conv_i @ lw[i].T                                      # (E,)
            g = jax.nn.sigmoid(z)
            new.append(cur[i] * g[None, :])
        cur = new
    return [c[:, None, :] for c in cur]


if __name__ == "__main__":
    M, B, E = 4, 8, 128                     # num_modal, batch, embed_dims
    key = jax.random.PRNGKey(0)
    kx, kc, kl = jax.random.split(key, 3)

    kxs = jax.random.split(kx, M)
    x_list = [jax.random.normal(kxs[i], (B, 1, E), jnp.float32) for i in range(M)]

    # Deterministic synthetic parameters (shapes per the module's __init__).
    kcs = jax.random.split(kc, 3)
    kls = jax.random.split(kl, 3)
    cws = [jax.random.normal(kcs[b], (M, M), jnp.float32) / jnp.sqrt(M)
           for b in range(3)]               # 1x1 Conv1d weights (bias=False)
    lws = [jax.random.normal(kls[b], (M, E, E), jnp.float32) / jnp.sqrt(E)
           for b in range(3)]               # Linear(E, E, bias=False) weights

    out_block, prevx = gated_block(x_list,
                                   cws[0], lws[0],
                                   cws[1], lws[1],
                                   cws[2], lws[2])
    out_block = jax.block_until_ready(out_block)

    ref = reference(x_list, cws, lws)
    for i in range(M):
        assert out_block[i].shape == (B, 1, E)
        assert jnp.allclose(out_block[i], ref[i], atol=1e-5, rtol=1e-5), \
            f"mismatch modality {i}"
        assert jnp.array_equal(prevx[i], x_list[i])

    print("KERNEL_OK")
</pallas_src>

<mosaic_0001>
module attributes {stable_mosaic.version = 11 : i64} {
  func.func @_apply_gate_kernel(%arg0: i32, %arg1: memref<4x8x128xf32, #tpu.memory_space<vmem>>, %arg2: memref<4x128xf32, #tpu.memory_space<vmem>>, %arg3: memref<4x8x128xf32, #tpu.memory_space<vmem>>) attributes {dimension_semantics = [#tpu.dimension_semantics<parallel>], iteration_bounds = array<i64: 1>, scalar_prefetch = 0 : i64, scratch_operands = 0 : i64, tpu.core_type = #tpu.core_type<tc>, window_params = [{transform_indices = @transform_0, window_bounds = array<i64: 4, 8, 128>}, {pipeline_mode = #tpu.pipeline_mode<synchronous>, transform_indices = @transform_1, window_bounds = array<i64: 4, 128>}, {transform_indices = @transform_2, window_bounds = array<i64: 4, 8, 128>}]} {
    %c0 = arith.constant 0 : index
    %c0_0 = arith.constant 0 : index
    %c0_1 = arith.constant 0 : index
    %0 = vector.load %arg1[%c0, %c0_0, %c0_1] : memref<4x8x128xf32, #tpu.memory_space<vmem>>, vector<4x8x128xf32>
    %c0_2 = arith.constant 0 : index
    %c0_3 = arith.constant 0 : index
    %1 = vector.load %arg2[%c0_2, %c0_3] : memref<4x128xf32, #tpu.memory_space<vmem>>, vector<4x128xf32>
    %2 = vector.shape_cast %1 : vector<4x128xf32> to vector<4x1x128xf32>
    %3 = vector.broadcast %2 : vector<4x1x128xf32> to vector<4x8x128xf32>
    %4 = arith.mulf %0, %3 : vector<4x8x128xf32>
    %c0_4 = arith.constant 0 : index
    %c0_5 = arith.constant 0 : index
    %c0_6 = arith.constant 0 : index
    %5 = vector.load %arg3[%c0_4, %c0_5, %c0_6] : memref<4x8x128xf32, #tpu.memory_space<vmem>>, vector<4x8x128xf32>
    tpu.vector_store %arg3[%c0_4, %c0_5, %c0_6], %4 {strides = array<i32>} : memref<4x8x128xf32, #tpu.memory_space<vmem>>, vector<4x8x128xf32>,
    return
  }
  func.func @transform_0(%arg0: i32) -> (i32, i32, i32) {
    %c0_i32 = arith.constant 0 : i32
    %c0_i32_0 = arith.constant 0 : i32
    %c0_i32_1 = arith.constant 0 : i32
    return %c0_i32, %arg0, %c0_i32_0 : i32, i32, i32
  }
  func.func @transform_1(%arg0: i32) -> (i32, i32) {
    %c0_i32 = arith.constant 0 : i32
    %c0_i32_0 = arith.constant 0 : i32
    %c0_i32_1 = arith.constant 0 : i32
    return %c0_i32, %c0_i32_0 : i32, i32
  }
  func.func @transform_2(%arg0: i32) -> (i32, i32, i32) {
    %c0_i32 = arith.constant 0 : i32
    %c0_i32_0 = arith.constant 0 : i32
    %c0_i32_1 = arith.constant 0 : i32
    return %c0_i32, %arg0, %c0_i32_0 : i32, i32, i32
  }
}

module attributes {stable_mosaic.version = 11 : i64} {
  func.func @_gate_kernel(%arg0: i32, %arg1: memref<4x8x128xf32, #tpu.memory_space<vmem>>, %arg2: memref<3x4x4x128xf32, #tpu.memory_space<vmem>>, %arg3: memref<512x128xf32, #tpu.memory_space<vmem>>, %arg4: memref<512x128xf32, #tpu.memory_space<vmem>>, %arg5: memref<512x128xf32, #tpu.memory_space<vmem>>, %arg6: memref<4x128xf32, #tpu.memory_space<vmem>>) attributes {dimension_semantics = [#tpu.dimension_semantics<arbitrary>], iteration_bounds = array<i64: 1>, scalar_prefetch = 0 : i64, scratch_operands = 0 : i64, tpu.core_type = #tpu.core_type<tc>, window_params = [{pipeline_mode = #tpu.pipeline_mode<synchronous>, transform_indices = @transform_0, window_bounds = array<i64: 4, 8, 128>}, {pipeline_mode = #tpu.pipeline_mode<synchronous>, transform_indices = @transform_1, window_bounds = array<i64: 3, 4, 4, 128>}, {pipeline_mode = #tpu.pipeline_mode<synchronous>, transform_indices = @transform_2, window_bounds = array<i64: 512, 128>}, {pipeline_mode = #tpu.pipeline_mode<synchronous>, transform_indices = @transform_3, window_bounds = array<i64: 512, 128>}, {pipeline_mode = #tpu.pipeline_mode<synchronous>, transform_indices = @transform_4, window_bounds = array<i64: 512, 128>}, {pipeline_mode = #tpu.pipeline_mode<synchronous>, transform_indices = @transform_5, window_bounds = array<i64: 4, 128>}]} {
    %c0 = arith.constant 0 : index
    %c0_0 = arith.constant 0 : index
    %c0_1 = arith.constant 0 : index
    %0 = vector.load %arg1[%c0, %c0_0, %c0_1] : memref<4x8x128xf32, #tpu.memory_space<vmem>>, vector<4x4x128xf32>
    %1 = tpu.iota {dimensions = array<i32: 0>} : vector<4x4x1xi32>
    %2 = tpu.iota {dimensions = array<i32: 1>} : vector<4x4x1xi32>
    %3 = arith.cmpi eq, %1, %2 : vector<4x4x1xi32>
    %c0_2 = arith.constant 0 : index
    %c0_3 = arith.constant 0 : index
    %c0_4 = arith.constant 0 : index
    %c0_5 = arith.constant 0 : index
    %4 = vector.load %arg2[%c0_2, %c0_3, %c0_4, %c0_5] : memref<3x4x4x128xf32, #tpu.memory_space<vmem>>, vector<1x4x4x128xf32>
    %5 = vector.shape_cast %4 : vector<1x4x4x128xf32> to vector<4x4x128xf32>
    %6 = arith.mulf %5, %0 : vector<4x4x128xf32>
    %cst = arith.constant dense<0.000000e+00> : vector<4x128xf32>
    %7 = vector.multi_reduction <add>, %6, %cst [0] : vector<4x4x128xf32> to vector<4x128xf32>
    %c0_6 = arith.constant 0 : index
    %c0_7 = arith.constant 0 : index
    %8 = vector.load %arg3[%c0_6, %c0_7] : memref<512x128xf32, #tpu.memory_space<vmem>>, vector<512x128xf32>
    %cst_8 = arith.constant dense<0.000000e+00> : vector<4x512xf32>
    %9 = tpu.matmul %7, %8, %cst_8 {dimension_numbers = #tpu.dot_dimension_numbers<[1], [1], [0], [0], [0, 0, 1, 0], [], []>} : vector<4x128xf32>, vector<512x128xf32>, vector<4x512xf32> -> vector<4x512xf32>
    %10 = vector.shape_cast %9 : vector<4x512xf32> to vector<4x4x128xf32>
    %cst_9 = arith.constant 0.000000e+00 : f32
    %11 = vector.shape_cast %3 : vector<4x4x1xi1> to vector<4x4x1xi1>
    %12 = vector.broadcast %11 : vector<4x4x1xi1> to vector<4x4x128xi1>
    %13 = vector.broadcast %cst_9 : f32 to vector<4x4x128xf32>
    %14 = arith.select %12, %10, %13 : vector<4x4x128xi1>, vector<4x4x128xf32>
    %cst_10 = arith.constant dense<0.000000e+00> : vector<4x128xf32>
    %15 = vector.multi_reduction <add>, %14, %cst_10 [1] : vector<4x4x128xf32> to vector<4x128xf32>
    %16 = arith.negf %15 : vector<4x128xf32>
    %17 = math.exp %16 : vector<4x128xf32>
    %cst_11 = arith.constant 1.000000e+00 : f32
    %18 = vector.broadcast %cst_11 : f32 to vector<4x128xf32>
    %19 = arith.addf %18, %17 : vector<4x128xf32>
    %20 = arith.divf %18, %19 : vector<4x128xf32>
    %21 = vector.shape_cast %20 : vector<4x128xf32> to vector<4x1x128xf32>
    %22 = vector.broadcast %21 : vector<4x1x128xf32> to vector<4x4x128xf32>
    %23 = arith.mulf %0, %22 : vector<4x4x128xf32>
    %c1 = arith.constant 1 : index
    %c0_12 = arith.constant 0 : index
    %c0_13 = arith.constant 0 : index
    %c0_14 = arith.constant 0 : index
    %24 = vector.load %arg2[%c1, %c0_12, %c0_13, %c0_14] : memref<3x4x4x128xf32, #tpu.memory_space<vmem>>, vector<1x4x4x128xf32>
    %25 = vector.shape_cast %24 : vector<1x4x4x128xf32> to vector<4x4x128xf32>
    %26 = arith.mulf %25, %23 : vector<4x4x128xf32>
    %cst_15 = arith.constant dense<0.000000e+00> : vector<4x128xf32>
    %27 = vector.multi_reduction <add>, %26, %cst_15 [0] : vector<4x4x128xf32> to vector<4x128xf32>
    %c0_16 = arith.constant 0 : index
    %c0_17 = arith.constant 0 : index
    %28 = vector.load %arg4[%c0_16, %c0_17] : memref<512x128xf32, #tpu.memory_space<vmem>>, vector<512x128xf32>
    %cst_18 = arith.constant dense<0.000000e+00> : vector<4x512xf32>
    %29 = tpu.matmul %27, %28, %cst_18 {dimension_numbers = #tpu.dot_dimension_numbers<[1], [1], [0], [0], [0, 0, 1, 0], [], []>} : vector<4x128xf32>, vector<512x128xf32>, vector<4x512xf32> -> vector<4x512xf32>
    %30 = vector.shape_cast %29 : vector<4x512xf32> to vector<4x4x128xf32>
    %cst_19 = arith.constant 0.000000e+00 : f32
    %31 = vector.shape_cast %3 : vector<4x4x1xi1> to vector<4x4x1xi1>
    %32 = vector.broadcast %31 : vector<4x4x1xi1> to vector<4x4x128xi1>
    %33 = vector.broadcast %cst_19 : f32 to vector<4x4x128xf32>
    %34 = arith.select %32, %30, %33 : vector<4x4x128xi1>, vector<4x4x128xf32>
    %cst_20 = arith.constant dense<0.000000e+00> : vector<4x128xf32>
    %35 = vector.multi_reduction <add>, %34, %cst_20 [1] : vector<4x4x128xf32> to vector<4x128xf32>
    %36 = arith.negf %35 : vector<4x128xf32>
    %37 = math.exp %36 : vector<4x128xf32>
    %cst_21 = arith.constant 1.000000e+00 : f32
    %38 = vector.broadcast %cst_21 : f32 to vector<4x128xf32>
    %39 = arith.addf %38, %37 : vector<4x128xf32>
    %40 = arith.divf %38, %39 : vector<4x128xf32>
    %41 = vector.shape_cast %40 : vector<4x128xf32> to vector<4x1x128xf32>
    %42 = vector.broadcast %41 : vector<4x1x128xf32> to vector<4x4x128xf32>
    %43 = arith.mulf %23, %42 : vector<4x4x128xf32>
    %44 = arith.mulf %20, %40 : vector<4x128xf32>
    %c2 = arith.constant 2 : index
    %c0_22 = arith.constant 0 : index
    %c0_23 = arith.constant 0 : index
    %c0_24 = arith.constant 0 : index
    %45 = vector.load %arg2[%c2, %c0_22, %c0_23, %c0_24] : memref<3x4x4x128xf32, #tpu.memory_space<vmem>>, vector<1x4x4x128xf32>
    %46 = vector.shape_cast %45 : vector<1x4x4x128xf32> to vector<4x4x128xf32>
    %47 = arith.mulf %46, %43 : vector<4x4x128xf32>
    %cst_25 = arith.constant dense<0.000000e+00> : vector<4x128xf32>
    %48 = vector.multi_reduction <add>, %47, %cst_25 [0] : vector<4x4x128xf32> to vector<4x128xf32>
    %c0_26 = arith.constant 0 : index
    %c0_27 = arith.constant 0 : index
    %49 = vector.load %arg5[%c0_26, %c0_27] : memref<512x128xf32, #tpu.memory_space<vmem>>, vector<512x128xf32>
    %cst_28 = arith.constant dense<0.000000e+00> : vector<4x512xf32>
    %50 = tpu.matmul %48, %49, %cst_28 {dimension_numbers = #tpu.dot_dimension_numbers<[1], [1], [0], [0], [0, 0, 1, 0], [], []>} : vector<4x128xf32>, vector<512x128xf32>, vector<4x512xf32> -> vector<4x512xf32>
    %51 = vector.shape_cast %50 : vector<4x512xf32> to vector<4x4x128xf32>
    %cst_29 = arith.constant 0.000000e+00 : f32
    %52 = vector.shape_cast %3 : vector<4x4x1xi1> to vector<4x4x1xi1>
    %53 = vector.broadcast %52 : vector<4x4x1xi1> to vector<4x4x128xi1>
    %54 = vector.broadcast %cst_29 : f32 to vector<4x4x128xf32>
    %55 = arith.select %53, %51, %54 : vector<4x4x128xi1>, vector<4x4x128xf32>
    %cst_30 = arith.constant dense<0.000000e+00> : vector<4x128xf32>
    %56 = vector.multi_reduction <add>, %55, %cst_30 [1] : vector<4x4x128xf32> to vector<4x128xf32>
    %57 = arith.negf %56 : vector<4x128xf32>
    %58 = math.exp %57 : vector<4x128xf32>
    %cst_31 = arith.constant 1.000000e+00 : f32
    %59 = vector.broadcast %cst_31 : f32 to vector<4x128xf32>
    %60 = arith.addf %59, %58 : vector<4x128xf32>
    %61 = arith.divf %59, %60 : vector<4x128xf32>
    %62 = arith.mulf %44, %61 : vector<4x128xf32>
    %c0_32 = arith.constant 0 : index
    %c0_33 = arith.constant 0 : index
    %63 = vector.load %arg6[%c0_32, %c0_33] : memref<4x128xf32, #tpu.memory_space<vmem>>, vector<4x128xf32>
    tpu.vector_store %arg6[%c0_32, %c0_33], %62 {strides = array<i32>} : memref<4x128xf32, #tpu.memory_space<vmem>>, vector<4x128xf32>,
    return
  }
  func.func @transform_0(%arg0: i32) -> (i32, i32, i32) {
    %c0_i32 = arith.constant 0 : i32
    %c0_i32_0 = arith.constant 0 : i32
    %c0_i32_1 = arith.constant 0 : i32
    %c0_i32_2 = arith.constant 0 : i32
    return %c0_i32, %c0_i32_0, %c0_i32_1 : i32, i32, i32
  }
  func.func @transform_1(%arg0: i32) -> (i32, i32, i32, i32) {
    %c0_i32 = arith.constant 0 : i32
    %c0_i32_0 = arith.constant 0 : i32
    %c0_i32_1 = arith.constant 0 : i32
    %c0_i32_2 = arith.constant 0 : i32
    %c0_i32_3 = arith.constant 0 : i32
    return %c0_i32, %c0_i32_0, %c0_i32_1, %c0_i32_2 : i32, i32, i32, i32
  }
  func.func @transform_2(%arg0: i32) -> (i32, i32) {
    %c0_i32 = arith.constant 0 : i32
    %c0_i32_0 = arith.constant 0 : i32
    %c0_i32_1 = arith.constant 0 : i32
    return %c0_i32, %c0_i32_0 : i32, i32
  }
  func.func @transform_3(%arg0: i32) -> (i32, i32) {
    %c0_i32 = arith.constant 0 : i32
    %c0_i32_0 = arith.constant 0 : i32
    %c0_i32_1 = arith.constant 0 : i32
    return %c0_i32, %c0_i32_0 : i32, i32
  }
  func.func @transform_4(%arg0: i32) -> (i32, i32) {
    %c0_i32 = arith.constant 0 : i32
    %c0_i32_0 = arith.constant 0 : i32
    %c0_i32_1 = arith.constant 0 : i32
    return %c0_i32, %c0_i32_0 : i32, i32
  }
  func.func @transform_5(%arg0: i32) -> (i32, i32) {
    %c0_i32 = arith.constant 0 : i32
    %c0_i32_0 = arith.constant 0 : i32
    %c0_i32_1 = arith.constant 0 : i32
    return %c0_i32, %c0_i32_0 : i32, i32
  }
}

</mosaic_0001>

<bundles_post_ra>
// kernel: gated_block.3
= control target key start
LH: loop header
LB: loop body
LE: loop exit
PB: predicated region body
PF: predicated region fallthrough
CT: control target
= control target key end

     0   :  { %s82_s0 = inlined_call_operand.vmem [shape: f32[4,8,128], index: 0, kind: input, shape index: {}]   ;;  %s83_s1 = inlined_call_operand.vmem [shape: f32[4,128], index: 1, kind: input, shape index: {}]   ;;  %s84_s2 = inlined_call_operand.vmem [shape: f32[4,8,128], index: 2, kind: output, shape index: {}]  }
   0x1   :  { %v11_v0 = vld [vmem:[%s82_s0] sm:$0xff]  ;;  %v12_v6 = vld [vmem:[%s82_s0 + $0x8] sm:$0xff]  ;;  %v13_v7 = vld [vmem:[%s82_s0 + $0x10] sm:$0xff] }
   0x2   :  { %v15_v1 = vld [vmem:[%s83_s1] sm:$0xf]  ;;  %v14_v8 = vld [vmem:[%s82_s0 + $0x18] sm:$0xff] }
   0x3   :  { %v20_v2 = vperm.slane %v15_v1, 0  ;;  %v17_v3 = vrot.slane %v15_v1, 1  ;;  %v18_v4 = vrot.slane %v15_v1, 2  ;;  %v19_v5 = vrot.slane %v15_v1, 3 }
   0x5   :  { %v28_v9 = vmul.f32 %v20_v2, %v11_v0  ;;  %v21_v10 = vperm.slane %v17_v3, 0  ;;  %v22_v11 = vperm.slane %v18_v4, 0  ;;  %v23_v12 = vperm.slane %v19_v5, 0 }
   0x7   :  { %32 = vst [vmem:[%s84_s2] sm:$0xff] %v28_v9  ;;  %v29_v13 = vmul.f32 %v21_v10, %v12_v6  ;;  %v30_v14 = vmul.f32 %v22_v11, %v13_v7  ;;  %v31_v15 = vmul.f32 %v23_v12, %v14_v8 }
   0x9   :  { %33 = vst [vmem:[%s84_s2 + $0x8] sm:$0xff] %v29_v13 }
   0xa   :  { %34 = vst [vmem:[%s84_s2 + $0x10] sm:$0xff] %v30_v14 }
   0xb   :  { %35 = vst [vmem:[%s84_s2 + $0x18] sm:$0xff] %v31_v15 }

// kernel: gated_block.2
= control target key start
LH: loop header
LB: loop body
LE: loop exit
PB: predicated region body
PF: predicated region fallthrough
CT: control target
= control target key end

     0   :  { %10 = vsyncpa [#allocation3], 0  ;;  %s1453_s0 = inlined_call_operand.vmem [shape: f32[4,8,128], index: 0, kind: input, shape index: {}]   ;;  %s1454_s1 = inlined_call_operand.vmem [shape: f32[3,4,4,128], index: 1, kind: input, shape index: {}]   ;;  %s1455_s2 = inlined_call_operand.hbm [shape: f32[512,128], index: 2, kind: input, shape index: {}]   ;;  %s1456_s3 = inlined_call_operand.hbm [shape: f32[512,128], index: 3, kind: input, shape index: {}]   ;;  %s1457_s4 = inlined_call_operand.hbm [shape: f32[512,128], index: 4, kind: input, shape index: {}]   ;;  %s1458_s5 = inlined_call_operand.vmem [shape: f32[4,128], index: 5, kind: output, shape index: {}]  }
   0x1   :  { %11 = vsyncpa [#allocation5], 0  ;;  %s33_s20 = sshll.u32 %s1456_s3, 4  ;;  %s1159_s21 = smov [#allocation4]   ;;  %s34_s20 = int_to_ptr.hbm [resolvable:$true] %s33_s20 }
   0x2   :  { %s35_s22 = sshll.u32 %s1159_s21, 4  ;;  %s20_s25 = sshll.u32 %s1455_s2, 4  ;;  %s36_s22 = int_to_ptr.vmem [resolvable:$true] %s35_s22  ;;  %s21_s25 = int_to_ptr.hbm [resolvable:$true] %s20_s25 }
   0x3   :  { %s1160_s26 = smov 128   ;;  %s1161_s27 = smov 8  }
   0x4   :  { %41 = dma.hbm_to_vmem [thread:$0]  %s34_s20, 8192, %s36_s22, [#allocation5], %s1160_s26, %s1160_s26, %s1161_s27  }
   0x5   :  { %s1162_s28 = smov [#allocation2]   ;;  %s46_s7 = sshll.u32 %s1457_s4, 4  ;;  %s47_s7 = int_to_ptr.hbm [resolvable:$true] %s46_s7 }
   0x6   :  { %s22_s29 = sshll.u32 %s1162_s28, 4  ;;  %s1163_s3 = smov [#allocation6]   ;;  %s23_s29 = int_to_ptr.vmem [resolvable:$true] %s22_s29 }
   0x7   :  { %28 = dma.hbm_to_vmem [thread:$0]  %s21_s25, 8192, %s23_s29, [#allocation3], %s1160_s26, %s1160_s26, %s1161_s27  }
   0x8   :  { %s48_s8 = sshll.u32 %s1163_s3, 4  ;;  %s49_s8 = int_to_ptr.vmem [resolvable:$true] %s48_s8 }
   0x9   :  { %54 = dma.hbm_to_vmem [thread:$0]  %s47_s7, 8192, %s49_s8, [#allocation5], %s1160_s26, %s1160_s26, %s1161_s27  }
   0xa   :  { %1155 = dma.done.wait [#allocation3], 8192  }
   0xb   :  { %1156 = vsyncadd [#allocation3], 4294959104 }
   0xc   :  { %1157 = dma.done.wait [#allocation5], 16384  }
   0xd   :  { %1158 = vsyncadd [#allocation5], 4294950912  ;;  %v140_v0 = vld [vmem:[#allocation2 + $0x178] sm:$0xff]  ;;  %v139_v4 = vld [vmem:[#allocation2 + $0x170] sm:$0xff]  ;;  %vm85_vm0 = vcmask 1043456   ;;  %vm238_vm1 = vcmask 1047556  }
   0xe   :  { %v156_v1 = vld [vmem:[#allocation2 + $0x1f8] sm:$0xff]  ;;  %197 = vmatpush.xpose.msra.mxu2 %v140_v0  ;;  %v155_v5 = vld [vmem:[#allocation2 + $0x1f0] sm:$0xff]  ;;  %v138_v8 = vld [vmem:[#allocation2 + $0x168] sm:$0xff] }
   0xf   :  { %217 = vmatpush.xpose.msra.mxu3 %v156_v1  ;;  %v108_v2 = vld [vmem:[#allocation2 + $0x78] sm:$0xff]  ;;  %v107_v6 = vld [vmem:[#allocation2 + $0x70] sm:$0xff]  ;;  %v154_v9 = vld [vmem:[#allocation2 + $0x1e8] sm:$0xff] }
  0x10   :  { %v124_v3 = vld [vmem:[#allocation2 + $0xf8] sm:$0xff]  ;;  %157 = vmatpush.xpose.msra.mxu0 %v108_v2  ;;  %v123_v7 = vld [vmem:[#allocation2 + $0xf0] sm:$0xff]  ;;  %v106_v10 = vld [vmem:[#allocation2 + $0x68] sm:$0xff] }
  0x11   :  { %177 = vmatpush.xpose.msra.mxu1 %v124_v3  ;;  %v122_v11 = vld [vmem:[#allocation2 + $0xe8] sm:$0xff]  ;;  %v137_v12 = vld [vmem:[#allocation2 + $0x160] sm:$0xff]  ;;  %v136_v16 = vld [vmem:[#allocation2 + $0x158] sm:$0xff] }
  0x12   :  { %198 = vmatpush.xpose.msra.mxu2 %v139_v4  ;;  %v153_v13 = vld [vmem:[#allocation2 + $0x1e0] sm:$0xff]  ;;  %v152_v17 = vld [vmem:[#allocation2 + $0x1d8] sm:$0xff]  ;;  %v135_v20 = vld [vmem:[#allocation2 + $0x150] sm:$0xff] }
  0x13   :  { %218 = vmatpush.xpose.msra.mxu3 %v155_v5  ;;  %v105_v14 = vld [vmem:[#allocation2 + $0x60] sm:$0xff]  ;;  %v104_v18 = vld [vmem:[#allocation2 + $0x58] sm:$0xff]  ;;  %v151_v21 = vld [vmem:[#allocation2 + $0x1d0] sm:$0xff] }
  0x14   :  { %158 = vmatpush.xpose.msra.mxu0 %v107_v6  ;;  %v121_v15 = vld [vmem:[#allocation2 + $0xe0] sm:$0xff]  ;;  %v120_v19 = vld [vmem:[#allocation2 + $0xd8] sm:$0xff]  ;;  %v103_v22 = vld [vmem:[#allocation2 + $0x50] sm:$0xff] }
  0x15   :  { %178 = vmatpush.xpose.msra.mxu1 %v123_v7  ;;  %v119_v23 = vld [vmem:[#allocation2 + $0xd0] sm:$0xff]  ;;  %v134_v24 = vld [vmem:[#allocation2 + $0x148] sm:$0xff]  ;;  %v133_v28 = vld [vmem:[#allocation2 + $0x140] sm:$0xff] }
  0x16   :  { %199 = vmatpush.xpose.msra.mxu2 %v138_v8  ;;  %v150_v25 = vld [vmem:[#allocation2 + $0x1c8] sm:$0xff]  ;;  %v149_v29 = vld [vmem:[#allocation2 + $0x1c0] sm:$0xff]  ;;  %v132_v32 = vld [vmem:[#allocation2 + $0x138] sm:$0xff] }
  0x17   :  { %219 = vmatpush.xpose.msra.mxu3 %v154_v9  ;;  %v102_v26 = vld [vmem:[#allocation2 + $0x48] sm:$0xff]  ;;  %v101_v30 = vld [vmem:[#allocation2 + $0x40] sm:$0xff]  ;;  %v148_v33 = vld [vmem:[#allocation2 + $0x1b8] sm:$0xff] }
  0x18   :  { %159 = vmatpush.xpose.msra.mxu0 %v106_v10  ;;  %v118_v27 = vld [vmem:[#allocation2 + $0xc8] sm:$0xff]  ;;  %v117_v31 = vld [vmem:[#allocation2 + $0xc0] sm:$0xff]  ;;  %v100_v34 = vld [vmem:[#allocation2 + $0x38] sm:$0xff] }
  0x19   :  { %179 = vmatpush.xpose.msra.mxu1 %v122_v11  ;;  %v116_v35 = vld [vmem:[#allocation2 + $0xb8] sm:$0xff]  ;;  %v131_v36 = vld [vmem:[#allocation2 + $0x130] sm:$0xff]  ;;  %v130_v40 = vld [vmem:[#allocation2 + $0x128] sm:$0xff] }
  0x1a   :  { %200 = vmatpush.xpose.msra.mxu2 %v137_v12  ;;  %v147_v37 = vld [vmem:[#allocation2 + $0x1b0] sm:$0xff]  ;;  %v146_v41 = vld [vmem:[#allocation2 + $0x1a8] sm:$0xff]  ;;  %v129_v44 = vld [vmem:[#allocation2 + $0x120] sm:$0xff] }
  0x1b   :  { %220 = vmatpush.xpose.msra.mxu3 %v153_v13  ;;  %v99_v38 = vld [vmem:[#allocation2 + $0x30] sm:$0xff]  ;;  %v98_v42 = vld [vmem:[#allocation2 + $0x28] sm:$0xff]  ;;  %v145_v45 = vld [vmem:[#allocation2 + $0x1a0] sm:$0xff] }
  0x1c   :  { %160 = vmatpush.xpose.msra.mxu0 %v105_v14  ;;  %v115_v39 = vld [vmem:[#allocation2 + $0xb0] sm:$0xff]  ;;  %v114_v43 = vld [vmem:[#allocation2 + $0xa8] sm:$0xff]  ;;  %v1208_v46 = vld [vmem:[%s1453_s0] sm:$0xf] }
  0x1d   :  { %180 = vmatpush.xpose.msra.mxu1 %v121_v15  ;;  %v1213_v47 = vld [vmem:[%s1453_s0 + $0x8] sm:$0xf]  ;;  %v77_v48 = vld [vmem:[%s1454_s1] sm:$0xf]  ;;  %v78_v49 = vld [vmem:[%s1454_s1 + $0x4] sm:$0xf] }
  0x1e   :  { %201 = vmatpush.xpose.msra.mxu2 %v136_v16  ;;  %v97_v50 = vld [vmem:[#allocation2 + $0x20] sm:$0xff]  ;;  %v128_v52 = vld [vmem:[#allocation2 + $0x118] sm:$0xff]  ;;  %v81_v53 = vmul.f32 %v77_v48, %v1208_v46  ;;  %v82_v54 = vmul.f32 %v78_v49, %v1213_v47  ;;  %v1226_v56 = vld [vmem:[%s1453_s0 + $0x10] sm:$0xf] }
  0x1f   :  { %221 = vmatpush.xpose.msra.mxu3 %v152_v17  ;;  %v113_v51 = vld [vmem:[#allocation2 + $0xa0] sm:$0xff]  ;;  %v144_v55 = vld [vmem:[#allocation2 + $0x198] sm:$0xff]  ;;  %v79_v57 = vld [vmem:[%s1454_s1 + $0x8] sm:$0xf] }
  0x20   :  { %161 = vmatpush.xpose.msra.mxu0 %v104_v18  ;;  %v96_v58 = vld [vmem:[#allocation2 + $0x18] sm:$0xff]  ;;  %v127_v60 = vld [vmem:[#allocation2 + $0x110] sm:$0xff]  ;;  %v83_v61 = vmul.f32 %v79_v57, %v1226_v56  ;;  %v86_v62 = vsel %vm85_vm0, %v81_v53, 0.0  ;;  %v87_v63 = vsel %vm85_vm0, %v82_v54, 0.0  ;;  %v80_v2 = vld [vmem:[%s1454_s1 + $0xc] sm:$0xf]  ;;  %v71_v57 = vlaneseq }
  0x21   :  { %181 = vmatpush.xpose.msra.mxu1 %v120_v19  ;;  %v112_v59 = vld [vmem:[#allocation2 + $0x98] sm:$0xff]  ;;  %v143_v0 = vld [vmem:[#allocation2 + $0x190] sm:$0xff]  ;;  %v88_v5 = vadd.f32 %v87_v63, %v86_v62  ;;  %v126_v8 = vld [vmem:[#allocation2 + $0x108] sm:$0xff]  ;;  %v1165_v63 = vmov 1934713408  }
  0x22   :  { %202 = vmatpush.xpose.msra.mxu2 %v135_v20  ;;  %v1237_v1 = vld [vmem:[%s1453_s0 + $0x18] sm:$0xf]  ;;  %v95_v3 = vld [vmem:[#allocation2 + $0x10] sm:$0xff]  ;;  %v89_v7 = vsel %vm85_vm0, %v83_v61, 0.0  ;;  %v142_v9 = vld [vmem:[#allocation2 + $0x188] sm:$0xff] }
  0x23   :  { %222 = vmatpush.xpose.msra.mxu3 %v151_v21  ;;  %v111_v4 = vld [vmem:[#allocation2 + $0x90] sm:$0xff]  ;;  %v84_v6 = vmul.f32 %v80_v2, %v1237_v1  ;;  %v94_v10 = vld [vmem:[#allocation2 + $0x8] sm:$0xff]  ;;  %v90_v12 = vadd.f32 %v89_v7, %v88_v5  ;;  %v125_v14 = vld [vmem:[#allocation2 + $0x100] sm:$0xff] }
  0x24   :  { %162 = vmatpush.xpose.msra.mxu0 %v103_v22  ;;  %v110_v11 = vld [vmem:[#allocation2 + $0x88] sm:$0xff]  ;;  %v141_v15 = vld [vmem:[#allocation2 + $0x180] sm:$0xff]  ;;  %v417_v19 = vld [vmem:[#allocation4 + $0x78] sm:$0xff] }
  0x25   :  { %182 = vmatpush.xpose.msra.mxu1 %v119_v23  ;;  %v91_v13 = vsel %vm85_vm0, %v84_v6, 0.0  ;;  %v93_v16 = vld [vmem:[#allocation2] sm:$0xff]  ;;  %v433_v20 = vld [vmem:[#allocation4 + $0xf8] sm:$0xff]  ;;  %v416_v23 = vld [vmem:[#allocation4 + $0x70] sm:$0xff]  ;;  %v1250_v6 = vshrl.u32 %v71_v57, 7 }
  0x26   :  { %203 = vmatpush.xpose.msra.mxu2 %v134_v24  ;;  %v109_v17 = vld [vmem:[#allocation2 + $0x80] sm:$0xff]  ;;  %v92_v18 = vadd.f32 %v91_v13, %v90_v12  ;;  %v449_v21 = vld [vmem:[#allocation4 + $0x178] sm:$0xff]  ;;  %v432_v24 = vld [vmem:[#allocation4 + $0xf0] sm:$0xff] }
  0x27   :  { %223 = vmatpush.xpose.msra.mxu3 %v150_v25  ;;  %v465_v22 = vld [vmem:[#allocation4 + $0x1f8] sm:$0xff]  ;;  %v448_v25 = vld [vmem:[#allocation4 + $0x170] sm:$0xff]  ;;  %v427_v48 = vld [vmem:[#allocation4 + $0xc8] sm:$0xff]  ;;  %vm73_vm2 = vcmp.eq.s32.totalorder %v1250_v6, 0  ;;  %vm1461_vm3 = vcmp.eq.s32.totalorder %v1250_v6, 2  ;;  %vm1460_vm4 = vcmp.eq.s32.totalorder %v1250_v6, 1 }
  0x28   :  { %163 = vmatpush.xpose.msra.mxu0 %v102_v26  ;;  %v464_v26 = vld [vmem:[#allocation4 + $0x1f0] sm:$0xff]  ;;  %v443_v49 = vld [vmem:[#allocation4 + $0x148] sm:$0xff]  ;;  %v458_v2 = vld [vmem:[#allocation4 + $0x1c0] sm:$0xff]  ;;  %vm1459_vm5 = vcmp.eq.s32.totalorder %v1250_v6, 3 }
  0x29   :  { %183 = vmatpush.xpose.msra.mxu1 %v118_v27  ;;  %v415_v27 = vld [vmem:[#allocation4 + $0x68] sm:$0xff]  ;;  %v457_v12 = vld [vmem:[#allocation4 + $0x1b8] sm:$0xff] }
  0x2a   :  { %204 = vmatpush.xpose.msra.mxu2 %v133_v28  ;;  %v431_v28 = vld [vmem:[#allocation4 + $0xe8] sm:$0xff]  ;;  %v405_v57 = vld [vmem:[#allocation4 + $0x18] sm:$0xff] }
  0x2b   :  { %224 = vmatpush.xpose.msra.mxu3 %v149_v29  ;;  %v447_v29 = vld [vmem:[#allocation4 + $0x168] sm:$0xff] }
  0x2c   :  { %164 = vmatpush.xpose.msra.mxu0 %v101_v30  ;;  %v463_v30 = vld [vmem:[#allocation4 + $0x1e8] sm:$0xff] }
  0x2d   :  { %184 = vmatpush.xpose.msra.mxu1 %v117_v31  ;;  %v414_v31 = vld [vmem:[#allocation4 + $0x60] sm:$0xff] }
  0x2e   :  { %205 = vmatpush.xpose.msra.mxu2 %v132_v32  ;;  %v430_v32 = vld [vmem:[#allocation4 + $0xe0] sm:$0xff] }
  0x2f   :  { %225 = vmatpush.xpose.msra.mxu3 %v148_v33  ;;  %v446_v33 = vld [vmem:[#allocation4 + $0x160] sm:$0xff] }
  0x30   :  { %165 = vmatpush.xpose.msra.mxu0 %v100_v34  ;;  %v462_v34 = vld [vmem:[#allocation4 + $0x1e0] sm:$0xff] }
  0x31   :  { %185 = vmatpush.xpose.msra.mxu1 %v116_v35  ;;  %v413_v35 = vld [vmem:[#allocation4 + $0x58] sm:$0xff] }
  0x32   :  { %206 = vmatpush.xpose.msra.mxu2 %v131_v36  ;;  %v429_v36 = vld [vmem:[#allocation4 + $0xd8] sm:$0xff] }
  0x33   :  { %226 = vmatpush.xpose.msra.mxu3 %v147_v37  ;;  %v445_v37 = vld [vmem:[#allocation4 + $0x158] sm:$0xff] }
  0x34   :  { %166 = vmatpush.xpose.msra.mxu0 %v99_v38  ;;  %v461_v38 = vld [vmem:[#allocation4 + $0x1d8] sm:$0xff] }
  0x35   :  { %186 = vmatpush.xpose.msra.mxu1 %v115_v39  ;;  %v412_v39 = vld [vmem:[#allocation4 + $0x50] sm:$0xff] }
  0x36   :  { %207 = vmatpush.xpose.msra.mxu2 %v130_v40  ;;  %v428_v40 = vld [vmem:[#allocation4 + $0xd0] sm:$0xff] }
  0x37   :  { %227 = vmatpush.xpose.msra.mxu3 %v146_v41  ;;  %v444_v41 = vld [vmem:[#allocation4 + $0x150] sm:$0xff] }
  0x38   :  { %167 = vmatpush.xpose.msra.mxu0 %v98_v42  ;;  %v460_v42 = vld [vmem:[#allocation4 + $0x1d0] sm:$0xff] }
  0x39   :  { %187 = vmatpush.xpose.msra.mxu1 %v114_v43  ;;  %v1164_v43 = vmov 1983009808  }
  0x3a   :  { %208 = vmatpush.xpose.msra.mxu2 %v129_v44  ;;  %v241_v44 = vunpack.c.l.s4 %v1164_v43 }
  0x3b   :  { %228 = vmatpush.xpose.msra.mxu3 %v145_v45  ;;  %v411_v45 = vld [vmem:[#allocation4 + $0x48] sm:$0xff] }
  0x3c   :  { %168 = vmatpush.xpose.msra.mxu0 %v97_v50  ;;  %v459_v50 = vld [vmem:[#allocation4 + $0x1c8] sm:$0xff] }
  0x3d   :  { %188 = vmatpush.xpose.msra.mxu1 %v113_v51 }
  0x3e   :  { %209 = vmatpush.xpose.msra.mxu2 %v128_v52 }
  0x3f   :  { %229 = vmatpush.xpose.msra.mxu3 %v144_v55  ;;  %v1245_v55 = vunpack.c.0.s8 %v241_v44 }
  0x40   :  { %169 = vmatpush.xpose.msra.mxu0 %v96_v58  ;;  %v410_v58 = vld [vmem:[#allocation4 + $0x40] sm:$0xff] }
  0x41   :  { %189 = vmatpush.xpose.msra.mxu1 %v112_v59  ;;  %v426_v59 = vld [vmem:[#allocation4 + $0xc0] sm:$0xff] }
  0x42   :  { %210 = vmatpush.xpose.msra.mxu2 %v127_v60  ;;  %v442_v60 = vld [vmem:[#allocation4 + $0x140] sm:$0xff] }
  0x43   :  { %230 = vmatpush.xpose.msra.mxu3 %v143_v0  ;;  %v255_v0 = vunpack.c.l.s4 %v1165_v63 }
  0x44   :  { %170 = vmatpush.xpose.msra.mxu0 %v95_v3 }
  0x45   :  { %190 = vmatpush.xpose.msra.mxu1 %v111_v4 }
  0x46   :  { %211 = vmatpush.xpose.msra.mxu2 %v126_v8  ;;  %v409_v8 = vld [vmem:[#allocation4 + $0x38] sm:$0xff] }
  0x47   :  { %231 = vmatpush.xpose.msra.mxu3 %v142_v9  ;;  %v425_v9 = vld [vmem:[#allocation4 + $0xb8] sm:$0xff] }
  0x48   :  { %171 = vmatpush.xpose.msra.mxu0 %v94_v10  ;;  %v441_v10 = vld [vmem:[#allocation4 + $0x138] sm:$0xff] }
  0x49   :  { %191 = vmatpush.xpose.msra.mxu1 %v110_v11  ;;  %v1253_v11 = vunpack.c.0.s8 %v255_v0 }
  0x4a   :  { %212 = vmatpush.xpose.msra.mxu2 %v125_v14 }
  0x4b   :  { %232 = vmatpush.xpose.msra.mxu3 %v141_v15 }
  0x4c   :  { %172 = vmatpush.xpose.msra.mxu0 %v93_v16 }
  0x4d   :  { %192 = vmatpush.xpose.msra.mxu1 %v109_v17  ;;  %213 = vmatmul.f32.vlgmr.msra.gmra.mxu2 %v92_v18  ;;  %v408_v17 = vld [vmem:[#allocation4 + $0x30] sm:$0xff] }
  0x4e   :  { %233 = vmatmul.f32.vlgmr.msra.gmra.mxu3 %v92_v18  ;;  %506 = vmatpush.xpose.msrb.mxu2 %v449_v21 }
  0x4f   :  { %173 = vmatmul.f32.vlgmr.msra.gmra.mxu0 %v92_v18  ;;  %526 = vmatpush.xpose.msrb.mxu3 %v465_v22  ;;  %v456_v22 = vld [vmem:[#allocation4 + $0x1b0] sm:$0xff] }
  0x50   :  { %193 = vmatmul.f32.vlgmr.msra.gmra.mxu1 %v92_v18  ;;  %466 = vmatpush.xpose.msrb.mxu0 %v417_v19  ;;  %v424_v18 = vld [vmem:[#allocation4 + $0xb0] sm:$0xff] }
  0x51   :  { %486 = vmatpush.xpose.msrb.mxu1 %v433_v20  ;;  %v440_v19 = vld [vmem:[#allocation4 + $0x130] sm:$0xff] }
  0x52   :  { %507 = vmatpush.xpose.msrb.mxu2 %v448_v25 }
  0x53   :  { %527 = vmatpush.xpose.msrb.mxu3 %v464_v26 }
  0x54   :  { %467 = vmatpush.xpose.msrb.mxu0 %v416_v23  ;;  %v407_v23 = vld [vmem:[#allocation4 + $0x28] sm:$0xff] }
  0x55   :  { %487 = vmatpush.xpose.msrb.mxu1 %v432_v24  ;;  %v423_v24 = vld [vmem:[#allocation4 + $0xa8] sm:$0xff] }
  0x56   :  { %508 = vmatpush.xpose.msrb.mxu2 %v447_v29  ;;  %v439_v29 = vld [vmem:[#allocation4 + $0x128] sm:$0xff] }
  0x57   :  { %528 = vmatpush.xpose.msrb.mxu3 %v463_v30  ;;  %v455_v30 = vld [vmem:[#allocation4 + $0x1a8] sm:$0xff] }
  0x58   :  { %468 = vmatpush.xpose.msrb.mxu0 %v415_v27 }
  0x59   :  { %488 = vmatpush.xpose.msrb.mxu1 %v431_v28 }
  0x5a   :  { %509 = vmatpush.xpose.msrb.mxu2 %v446_v33 }
  0x5b   :  { %529 = vmatpush.xpose.msrb.mxu3 %v462_v34 }
  0x5c   :  { %469 = vmatpush.xpose.msrb.mxu0 %v414_v31 }
  0x5d   :  { %489 = vmatpush.xpose.msrb.mxu1 %v430_v32 }
  0x5e   :  { %510 = vmatpush.xpose.msrb.mxu2 %v445_v37 }
  0x5f   :  { %530 = vmatpush.xpose.msrb.mxu3 %v461_v38 }
  0x60   :  { %470 = vmatpush.xpose.msrb.mxu0 %v413_v35 }
  0x61   :  { %490 = vmatpush.xpose.msrb.mxu1 %v429_v36 }
  0x62   :  { %511 = vmatpush.xpose.msrb.mxu2 %v444_v41 }
  0x63   :  { %531 = vmatpush.xpose.msrb.mxu3 %v460_v42 }
  0x64   :  { %471 = vmatpush.xpose.msrb.mxu0 %v412_v39  ;;  %v406_v39 = vld [vmem:[#allocation4 + $0x20] sm:$0xff] }
  0x65   :  { %491 = vmatpush.xpose.msrb.mxu1 %v428_v40  ;;  %v422_v40 = vld [vmem:[#allocation4 + $0xa0] sm:$0xff] }
  0x66   :  { %512 = vmatpush.xpose.msrb.mxu2 %v443_v49 }
  0x67   :  { %532 = vmatpush.xpose.msrb.mxu3 %v459_v50 }
  0x68   :  { %472 = vmatpush.xpose.msrb.mxu0 %v411_v45  ;;  %v438_v45 = vld [vmem:[#allocation4 + $0x120] sm:$0xff] }
  0x69   :  { %492 = vmatpush.xpose.msrb.mxu1 %v427_v48  ;;  %v454_v48 = vld [vmem:[#allocation4 + $0x1a0] sm:$0xff] }
  0x6a   :  { %513 = vmatpush.xpose.msrb.mxu2 %v442_v60 }
  0x6b   :  { %533 = vmatpush.xpose.msrb.mxu3 %v458_v2 }
  0x6c   :  { %473 = vmatpush.xpose.msrb.mxu0 %v410_v58  ;;  %v421_v58 = vld [vmem:[#allocation4 + $0x98] sm:$0xff] }
  0x6d   :  { %493 = vmatpush.xpose.msrb.mxu1 %v426_v59 }
  0x6e   :  { %514 = vmatpush.xpose.msrb.mxu2 %v441_v10 }
  0x6f   :  { %534 = vmatpush.xpose.msrb.mxu3 %v457_v12  ;;  %v436_v12 = vld [vmem:[#allocation4 + $0x110] sm:$0xff] }
  0x70   :  { %474 = vmatpush.xpose.msrb.mxu0 %v409_v8  ;;  %v420_v8 = vld [vmem:[#allocation4 + $0x90] sm:$0xff] }
  0x71   :  { %494 = vmatpush.xpose.msrb.mxu1 %v425_v9 }
  0x72   :  { %515 = vmatpush.xpose.msrb.mxu2 %v440_v19 }
  0x73   :  { %535 = vmatpush.xpose.msrb.mxu3 %v456_v22  ;;  %v435_v22 = vld [vmem:[#allocation4 + $0x108] sm:$0xff] }
  0x74   :  { %475 = vmatpush.xpose.msrb.mxu0 %v408_v17 }
  0x75   :  { %495 = vmatpush.xpose.msrb.mxu1 %v424_v18 }
  0x76   :  { %516 = vmatpush.xpose.msrb.mxu2 %v439_v29  ;;  %v450_v29 = vld [vmem:[#allocation4 + $0x180] sm:$0xff] }
  0x77   :  { %536 = vmatpush.xpose.msrb.mxu3 %v455_v30 }
  0x78   :  { %476 = vmatpush.xpose.msrb.mxu0 %v407_v23  ;;  %v451_v23 = vld [vmem:[#allocation4 + $0x188] sm:$0xff] }
  0x79   :  { %496 = vmatpush.xpose.msrb.mxu1 %v423_v24 }
  0x7a   :  { %517 = vmatpush.xpose.msrb.mxu2 %v438_v45 }
  0x7b   :  { %537 = vmatpush.xpose.msrb.mxu3 %v454_v48  ;;  %v719_v48 = vld [vmem:[#allocation6 + $0x68] sm:$0xff] }
  0x7c   :  { %477 = vmatpush.xpose.msrb.mxu0 %v406_v39 }
  0x7d   :  { %497 = vmatpush.xpose.msrb.mxu1 %v422_v40 }
  0x80   :  { %478 = vmatpush.xpose.msrb.mxu0 %v405_v57 }
  0x81   :  { %498 = vmatpush.xpose.msrb.mxu1 %v421_v58 }
  0x85   :  { %499 = vmatpush.xpose.msrb.mxu1 %v420_v8 }
  0xcc   :  { %v174_v51 = vpop.f32.mrf.mxu0 }
  0xcd   :  { %v194_v52 = vpop.f32.mrf.mxu1 }
  0xd0   :  { %v214_v53 = vpop.f32.mrf.mxu2 }
  0xd1   :  { %v234_v54 = vpop.f32.mrf.mxu3  ;;  %v237_v61 = vrot.slane %v214_v53, 4 }
  0xd2   :  { %v244_v62 = vrot.slane %v234_v54, 4 }
  0xd3   :  { %v239_v3 = vsel %vm238_vm1, %v237_v61, %v174_v51  ;;  %v437_v61 = vld [vmem:[#allocation4 + $0x118] sm:$0xff] }
  0xd4   :  { %v245_v4 = vsel %vm238_vm1, %v244_v62, %v194_v52  ;;  %v243_v5 = vperm.slane %v239_v3, %v1245_v55  ;;  %v453_v62 = vld [vmem:[#allocation4 + $0x198] sm:$0xff]  ;;  %518 = vmatpush.xpose.msrb.mxu2 %v437_v61 }
  0xd5   :  { %v249_v7 = vperm.slane %v245_v4, %v1245_v55  ;;  %538 = vmatpush.xpose.msrb.mxu3 %v453_v62 }
  0xd6   :  { %v252_v13 = vrot.slane %v243_v5, 4 }
  0xd7   :  { %v250_v14 = vrot.slane %v249_v7, 4 }
  0xd8   :  { %v253_v16 = vsel %vm238_vm1, %v249_v7, %v252_v13  ;;  %v404_v7 = vld [vmem:[#allocation4 + $0x10] sm:$0xff]  ;;  %519 = vmatpush.xpose.msrb.mxu2 %v436_v12 }
  0xd9   :  { %v251_v15 = vsel %vm238_vm1, %v250_v14, %v243_v5  ;;  %v261_v21 = vperm.slane %v253_v16, %v1253_v11  ;;  %v452_v13 = vld [vmem:[#allocation4 + $0x190] sm:$0xff]  ;;  %479 = vmatpush.xpose.msrb.mxu0 %v404_v7 }
  0xda   :  { %v257_v20 = vperm.slane %v251_v15, %v1253_v11  ;;  %539 = vmatpush.xpose.msrb.mxu3 %v452_v13 }
  0xdb   :  { %v264_v26 = vrot.slane %v261_v21, 4  ;;  %v276_v28 = vsel %vm1461_vm3, %v261_v21, 0.0  ;;  %v419_v21 = vld [vmem:[#allocation4 + $0x88] sm:$0xff] }
  0xdc   :  { %v262_v25 = vrot.slane %v257_v20, 4  ;;  %v274_v27 = vsel %vm73_vm2, %v257_v20, 0.0  ;;  %v292_v32 = vsel %vm85_vm0, %v276_v28, 0.0  ;;  %v403_v20 = vld [vmem:[#allocation4 + $0x8] sm:$0xff]  ;;  %500 = vmatpush.xpose.msrb.mxu1 %v419_v21  ;;  %520 = vmatpush.xpose.msrb.mxu2 %v435_v22  ;;  %v434_v28 = vld [vmem:[#allocation4 + $0x100] sm:$0xff] }
  0xdd   :  { %v278_v31 = vsel %vm85_vm0, %v274_v27, 0.0  ;;  %v265_v34 = vsel %vm238_vm1, 0.0, %v264_v26  ;;  %v293_v36 = vrot.slane %v292_v32, 4  ;;  %480 = vmatpush.xpose.msrb.mxu0 %v403_v20  ;;  %v402_v26 = vld [vmem:[#allocation4] sm:$0xff] }
  0xde   :  { %v263_v33 = vsel %vm238_vm1, 0.0, %v262_v25  ;;  %v279_v35 = vrot.slane %v278_v31, 4  ;;  %v277_v38 = vsel %vm1459_vm5, %v265_v34, 0.0  ;;  %540 = vmatpush.xpose.msrb.mxu3 %v451_v23  ;;  %v418_v27 = vld [vmem:[#allocation4 + $0x80] sm:$0xff] }
  0xdf   :  { %v275_v37 = vsel %vm1460_vm4, %v263_v33, 0.0  ;;  %v294_v43 = vadd.f32 %v293_v36, %v292_v32  ;;  %v299_v44 = vsel %vm85_vm0, %v277_v38, 0.0 }
  0xe0   :  { %v280_v41 = vadd.f32 %v279_v35, %v278_v31  ;;  %v285_v42 = vsel %vm85_vm0, %v275_v37, 0.0  ;;  %v300_v50 = vrot.slane %v299_v44, 4  ;;  %501 = vmatpush.xpose.msrb.mxu1 %v418_v27  ;;  %521 = vmatpush.xpose.msrb.mxu2 %v434_v28 }
  0xe1   :  { %v286_v49 = vrot.slane %v285_v42, 4  ;;  %v295_v52 = vrot.slane %v294_v43, 2  ;;  %481 = vmatpush.xpose.msrb.mxu0 %v402_v26 }
  0xe2   :  { %v281_v51 = vrot.slane %v280_v41, 2  ;;  %v301_v54 = vadd.f32 %v300_v50, %v299_v44  ;;  %541 = vmatpush.xpose.msrb.mxu3 %v450_v29  ;;  %v1015_v29 = vld [vmem:[%s1454_s1 + $0x1c] sm:$0xf] }
  0xe3   :  { %v287_v53 = vadd.f32 %v286_v49, %v285_v42  ;;  %v296_v60 = vadd.f32 %v295_v52, %v294_v43 }
  0xe4   :  { %v282_v59 = vadd.f32 %v281_v51, %v280_v41  ;;  %v302_v0 = vrot.slane %v301_v54, 2 }
  0xe5   :  { %v288_v63 = vrot.slane %v287_v53, 2  ;;  %v297_v3 = vrot.slane %v296_v60, 1 }
  0xe6   :  { %v283_v2 = vrot.slane %v282_v59, 1  ;;  %v303_v5 = vadd.f32 %v302_v0, %v301_v54  ;;  %v748_v0 = vld [vmem:[#allocation6 + $0x150] sm:$0xff] }
  0xe7   :  { %v289_v4 = vadd.f32 %v288_v63, %v287_v53  ;;  %v298_v10 = vadd.f32 %v297_v3, %v296_v60 }
  0xe8   :  { %v284_v9 = vadd.f32 %v283_v2, %v282_v59  ;;  %v304_v15 = vrot.slane %v303_v5, 1 }
  0xe9   :  { %v290_v14 = vrot.slane %v289_v4, 1  ;;  %v1010_v17 = vmul.f32 -1.442695, %v298_v10 }
  0xea   :  { %v1008_v16 = vmul.f32 -1.442695, %v284_v9  ;;  %v305_v19 = vadd.f32 %v304_v15, %v303_v5 }
  0xeb   :  { %v291_v18 = vadd.f32 %v290_v14, %v289_v4 }
  0xec   :  { %1035 = vpow2.f32 %v1008_v16  ;;  %v1011_v25 = vmul.f32 -1.442695, %v305_v19  ;;  %v1012_v19 = vld [vmem:[%s1454_s1 + $0x10] sm:$0xf] }
  0xed   :  { %v1009_v24 = vmul.f32 -1.442695, %v291_v18  ;;  %1037 = vpow2.f32 %v1010_v17 }
  0xef   :  { %1039 = vpow2.f32 %v1009_v24 }
  0xf0   :  { %1041 = vpow2.f32 %v1011_v25  ;;  %v1014_v25 = vld [vmem:[%s1454_s1 + $0x18] sm:$0xf] }
  0xf2   :  { %v1036_v30 = vpop.eup %1035 }
  0xf3   :  { %v1038_v31 = vpop.eup %1037  ;;  %v318_v32 = vadd.f32 1.0, %v1036_v30 }
  0xf4   :  { %v320_v33 = vadd.f32 1.0, %v1038_v31 }
  0xf5   :  { %v1040_v34 = vpop.eup %1039  ;;  %1043 = vrcp.f32 %v318_v32  ;;  %v331_v38 = vand.u32 2147483647, %v318_v32  ;;  %v333_v40 = vand.u32 2147483648, %v318_v32  ;;  %vm327_vm6 = vweird.f32 %v318_v32 }
  0xf6   :  { %v1042_v35 = vpop.eup %1041  ;;  %v319_v36 = vadd.f32 1.0, %v1040_v34  ;;  %1045 = vrcp.f32 %v320_v33  ;;  %vm357_vm7 = vweird.f32 %v320_v33  ;;  %v361_v49 = vand.u32 2147483647, %v320_v33 }
  0xf7   :  { %v321_v37 = vadd.f32 1.0, %v1042_v35  ;;  %vm1277_vm8 = vcmp.eq.f32.partialorder %v331_v38, 8.507059e+37  ;;  %v363_v50 = vand.u32 2147483648, %v320_v33  ;;  %v334_v52 = vor.u32 1.1754944e-38, %v333_v40  ;;  %v721_v38 = vld [vmem:[#allocation6 + $0x78] sm:$0xff] }
  0xf8   :  { %1047 = vrcp.f32 %v319_v36  ;;  %vm342_vm9 = vweird.f32 %v319_v36  ;;  %v346_v58 = vand.u32 2147483647, %v319_v36  ;;  %v348_v61 = vand.u32 2147483648, %v319_v36  ;;  %v753_v40 = vld [vmem:[#allocation6 + $0x178] sm:$0xff]  ;;  %770 = vmatpush.xpose.msra.mxu0 %v721_v38 }
  0xf9   :  { %1049 = vrcp.f32 %v321_v37  ;;  %vm1281_vm12 = vcmp.eq.f32.partialorder %v361_v49, 8.507059e+37  ;;  %v364_v2 = vor.u32 1.1754944e-38, %v363_v50  ;;  %v378_v7 = vand.u32 2147483648, %v321_v37  ;;  %810 = vmatpush.xpose.msra.mxu2 %v753_v40  ;;  %v735_v49 = vld [vmem:[#allocation6 + $0xe8] sm:$0xff]  ;;  %v760_v40 = vld [vmem:[#allocation6 + $0x1b0] sm:$0xff] }
  0xfa   :  { %v376_v10 = vand.u32 2147483647, %v321_v37  ;;  %vm372_vm4 = vweird.f32 %v321_v37  ;;  %v349_v15 = vor.u32 1.1754944e-38, %v348_v61  ;;  %v751_v50 = vld [vmem:[#allocation6 + $0x168] sm:$0xff]  ;;  %v765_v61 = vld [vmem:[#allocation6 + $0x1d8] sm:$0xff] }
  0xfb   :  { %v1044_v39 = vpop.eup %1043  ;;  %v379_v21 = vor.u32 1.1754944e-38, %v378_v7  ;;  %v763_v7 = vld [vmem:[#allocation6 + $0x1c8] sm:$0xff] }
  0xfc   :  { %v1046_v41 = vpop.eup %1045  ;;  %v323_v42 = vmul.f32 %v1044_v39, %v318_v32  ;;  %vm328_vm10 = vweird.f32 %v1044_v39 }
  0xfd   :  { %v353_v43 = vmul.f32 %v1046_v41, %v320_v33  ;;  %vm358_vm11 = vweird.f32 %v1046_v41  ;;  %vm329_vm13 = vmor %vm327_vm6, %vm328_vm10  ;;  %vm347_vm6 = vcmp.eq.f32.partialorder %v346_v58, 8.507059e+37  ;;  %v717_v58 = vld [vmem:[#allocation6 + $0x58] sm:$0xff] }
  0xfe   :  { %v1048_v44 = vpop.eup %1047  ;;  %v324_v45 = vsub.f32 1.0, %v323_v42  ;;  %vm359_vm15 = vmor %vm357_vm7, %vm358_vm11  ;;  %v720_v42 = vld [vmem:[#allocation6 + $0x70] sm:$0xff] }
  0xff   :  { %v1050_v51 = vpop.eup %1049  ;;  %v338_v53 = vmul.f32 %v1048_v44, %v319_v36  ;;  %v354_v54 = vsub.f32 1.0, %v353_v43  ;;  %vm343_vm14 = vweird.f32 %v1048_v44  ;;  %v736_v43 = vld [vmem:[#allocation6 + $0xf0] sm:$0xff]  ;;  %771 = vmatpush.xpose.msra.mxu0 %v720_v42  ;;  %v727_v42 = vld [vmem:[#allocation6 + $0xa8] sm:$0xff] }
 0x100   :  { %v325_v57 = vmul.f32 %v1044_v39, %v324_v45  ;;  %v368_v59 = vmul.f32 %v1050_v51, %v321_v37  ;;  %vm373_vm5 = vweird.f32 %v1050_v51  ;;  %vm344_vm3 = vmor %vm342_vm9, %vm343_vm14  ;;  %v768_v45 = vld [vmem:[#allocation6 + $0x1f0] sm:$0xff] }
 0x101   :  { %v339_v60 = vsub.f32 1.0, %v338_v53  ;;  %v355_v62 = vmul.f32 %v1046_v41, %v354_v54  ;;  %vm374_vm7 = vmor %vm372_vm4, %vm373_vm5  ;;  %v734_v53 = vld [vmem:[#allocation6 + $0xe0] sm:$0xff]  ;;  %vm1467_vm4 = vcmp.eq.s32.totalorder %v1250_v6, 1  ;;  %vm1468_vm5 = vcmp.eq.s32.totalorder %v1250_v6, 3 }
 0x102   :  { %v326_v63 = vadd.f32 %v1044_v39, %v325_v57  ;;  %v369_v3 = vsub.f32 1.0, %v368_v59  ;;  %v750_v54 = vld [vmem:[#allocation6 + $0x160] sm:$0xff]  ;;  %v733_v59 = vld [vmem:[#allocation6 + $0xd8] sm:$0xff] }
 0x103   :  { %v340_v4 = vmul.f32 %v1048_v44, %v339_v60  ;;  %v356_v5 = vadd.f32 %v1046_v41, %v355_v62  ;;  %772 = vmatpush.xpose.msra.mxu0 %v719_v48  ;;  %v766_v57 = vld [vmem:[#allocation6 + $0x1e0] sm:$0xff]  ;;  %v749_v60 = vld [vmem:[#allocation6 + $0x158] sm:$0xff]  ;;  %v716_v62 = vld [vmem:[#allocation6 + $0x50] sm:$0xff] }
 0x104   :  { %v330_v8 = vsel %vm329_vm13, %v1044_v39, %v326_v63  ;;  %v370_v9 = vmul.f32 %v1050_v51, %v369_v3  ;;  %v737_v39 = vld [vmem:[#allocation6 + $0xf8] sm:$0xff]  ;;  %v732_v63 = vld [vmem:[#allocation6 + $0xd0] sm:$0xff]  ;;  %v715_v3 = vld [vmem:[#allocation6 + $0x48] sm:$0xff] }
 0x105   :  { %v1289_v12 = vsel %vm1277_vm8, %v334_v52, %v330_v8  ;;  %v341_v13 = vadd.f32 %v1048_v44, %v340_v4  ;;  %v360_v14 = vsel %vm359_vm15, %v1046_v41, %v356_v5  ;;  %vm377_vm8 = vcmp.eq.f32.partialorder %v376_v10, 8.507059e+37  ;;  %790 = vmatpush.xpose.msra.mxu1 %v737_v39  ;;  %v769_v41 = vld [vmem:[#allocation6 + $0x1f8] sm:$0xff]  ;;  %v718_v52 = vld [vmem:[#allocation6 + $0x60] sm:$0xff]  ;;  %v731_v4 = vld [vmem:[#allocation6 + $0xc8] sm:$0xff] }
 0x106   :  { %v1294_v16 = vsel %vm1281_vm12, %v364_v2, %v360_v14  ;;  %v371_v17 = vadd.f32 %v1050_v51, %v370_v9  ;;  %v1298_v18 = vmul.f32 %v1289_v12, %v1208_v46  ;;  %v1013_v46 = vld [vmem:[%s1454_s1 + $0x14] sm:$0xf]  ;;  %830 = vmatpush.xpose.msra.mxu3 %v769_v41  ;;  %v747_v5 = vld [vmem:[#allocation6 + $0x148] sm:$0xff]  ;;  %v714_v10 = vld [vmem:[#allocation6 + $0x40] sm:$0xff] }
 0x107   :  { %v345_v20 = vsel %vm344_vm3, %v1048_v44, %v341_v13  ;;  %v1305_v22 = vmul.f32 %v1294_v16, %v1226_v56  ;;  %v752_v44 = vld [vmem:[#allocation6 + $0x170] sm:$0xff]  ;;  %773 = vmatpush.xpose.msra.mxu0 %v718_v52  ;;  %v730_v13 = vld [vmem:[#allocation6 + $0xc0] sm:$0xff]  ;;  %v711_v41 = vld [vmem:[#allocation6 + $0x28] sm:$0xff]  ;;  %vm1466_vm3 = vcmp.eq.s32.totalorder %v1250_v6, 2 }
 0x108   :  { %v1307_v23 = vsel %vm347_vm6, %v349_v15, %v345_v20  ;;  %v375_v24 = vsel %vm374_vm7, %v1050_v51, %v371_v17  ;;  %v391_v56 = vmul.f32 %v1012_v19, %v1298_v18  ;;  %811 = vmatpush.xpose.msra.mxu2 %v752_v44  ;;  %v767_v51 = vld [vmem:[#allocation6 + $0x1e8] sm:$0xff]  ;;  %v764_v2 = vld [vmem:[#allocation6 + $0x1d0] sm:$0xff]  ;;  %v746_v14 = vld [vmem:[#allocation6 + $0x140] sm:$0xff] }
 0x109   :  { %v1315_v26 = vsel %vm377_vm8, %v379_v21, %v375_v24  ;;  %v1319_v27 = vmul.f32 %v1307_v23, %v1213_v47  ;;  %v393_v31 = vmul.f32 %v1014_v25, %v1305_v22  ;;  %791 = vmatpush.xpose.msra.mxu1 %v736_v43  ;;  %v762_v19 = vld [vmem:[#allocation6 + $0x1c0] sm:$0xff] }
 0x10a   :  { %v1324_v28 = vmul.f32 %v1315_v26, %v1237_v1  ;;  %v395_v33 = vsel %vm85_vm0, %v391_v56, 0.0  ;;  %831 = vmatpush.xpose.msra.mxu3 %v768_v45 }
 0x10b   :  { %v392_v30 = vmul.f32 %v1013_v46, %v1319_v27  ;;  %v398_v35 = vsel %vm85_vm0, %v393_v31, 0.0  ;;  %774 = vmatpush.xpose.msra.mxu0 %v717_v58  ;;  %v745_v31 = vld [vmem:[#allocation6 + $0x138] sm:$0xff] }
 0x10c   :  { %v394_v32 = vmul.f32 %v1015_v29, %v1324_v28  ;;  %812 = vmatpush.xpose.msra.mxu2 %v751_v50  ;;  %v713_v29 = vld [vmem:[#allocation6 + $0x38] sm:$0xff]  ;;  %v759_v50 = vld [vmem:[#allocation6 + $0x1a8] sm:$0xff] }
 0x10d   :  { %v396_v47 = vsel %vm85_vm0, %v392_v30, 0.0  ;;  %792 = vmatpush.xpose.msra.mxu1 %v735_v49  ;;  %v729_v30 = vld [vmem:[#allocation6 + $0xb8] sm:$0xff]  ;;  %v743_v49 = vld [vmem:[#allocation6 + $0x128] sm:$0xff] }
 0x10e   :  { %v397_v34 = vadd.f32 %v396_v47, %v395_v33  ;;  %v400_v1 = vsel %vm85_vm0, %v394_v32, 0.0  ;;  %832 = vmatpush.xpose.msra.mxu3 %v767_v51  ;;  %v761_v32 = vld [vmem:[#allocation6 + $0x1b8] sm:$0xff] }
 0x10f   :  { %775 = vmatpush.xpose.msra.mxu0 %v716_v62  ;;  %v726_v62 = vld [vmem:[#allocation6 + $0xa0] sm:$0xff] }
 0x110   :  { %v399_v36 = vadd.f32 %v398_v35, %v397_v34  ;;  %813 = vmatpush.xpose.msra.mxu2 %v750_v54 }
 0x111   :  { %793 = vmatpush.xpose.msra.mxu1 %v734_v53 }
 0x112   :  { %v401_v37 = vadd.f32 %v400_v1, %v399_v36  ;;  %833 = vmatpush.xpose.msra.mxu3 %v766_v57  ;;  %v712_v36 = vld [vmem:[#allocation6 + $0x30] sm:$0xff] }
 0x113   :  { %776 = vmatpush.xpose.msra.mxu0 %v715_v3  ;;  %v728_v1 = vld [vmem:[#allocation6 + $0xb0] sm:$0xff] }
 0x114   :  { %482 = vmatmul.f32.vlgmr.msrb.gmra.mxu0 %v401_v37  ;;  %502 = vmatmul.f32.vlgmr.msrb.gmra.mxu1 %v401_v37 }
 0x115   :  { %522 = vmatmul.f32.vlgmr.msrb.gmra.mxu2 %v401_v37  ;;  %542 = vmatmul.f32.vlgmr.msrb.gmra.mxu3 %v401_v37  ;;  %v744_v37 = vld [vmem:[#allocation6 + $0x130] sm:$0xff] }
 0x116   :  { %794 = vmatpush.xpose.msra.mxu1 %v733_v59  ;;  %814 = vmatpush.xpose.msra.mxu2 %v749_v60 }
 0x117   :  { %834 = vmatpush.xpose.msra.mxu3 %v765_v61  ;;  %777 = vmatpush.xpose.msra.mxu0 %v714_v10  ;;  %v710_v61 = vld [vmem:[#allocation6 + $0x20] sm:$0xff] }
 0x11a   :  { %795 = vmatpush.xpose.msra.mxu1 %v732_v63  ;;  %815 = vmatpush.xpose.msra.mxu2 %v748_v0 }
 0x11b   :  { %835 = vmatpush.xpose.msra.mxu3 %v764_v2  ;;  %778 = vmatpush.xpose.msra.mxu0 %v713_v29 }
 0x11e   :  { %796 = vmatpush.xpose.msra.mxu1 %v731_v4  ;;  %816 = vmatpush.xpose.msra.mxu2 %v747_v5  ;;  %v742_v4 = vld [vmem:[#allocation6 + $0x120] sm:$0xff] }
 0x11f   :  { %836 = vmatpush.xpose.msra.mxu3 %v763_v7  ;;  %779 = vmatpush.xpose.msra.mxu0 %v712_v36  ;;  %v758_v5 = vld [vmem:[#allocation6 + $0x1a0] sm:$0xff]  ;;  %v756_v36 = vld [vmem:[#allocation6 + $0x190] sm:$0xff] }
 0x122   :  { %797 = vmatpush.xpose.msra.mxu1 %v730_v13  ;;  %817 = vmatpush.xpose.msra.mxu2 %v746_v14 }
 0x123   :  { %837 = vmatpush.xpose.msra.mxu3 %v762_v19  ;;  %780 = vmatpush.xpose.msra.mxu0 %v711_v41 }
 0x126   :  { %798 = vmatpush.xpose.msra.mxu1 %v729_v30  ;;  %818 = vmatpush.xpose.msra.mxu2 %v745_v31 }
 0x127   :  { %838 = vmatpush.xpose.msra.mxu3 %v761_v32  ;;  %781 = vmatpush.xpose.msra.mxu0 %v710_v61  ;;  %v708_v32 = vld [vmem:[#allocation6 + $0x10] sm:$0xff] }
 0x12a   :  { %799 = vmatpush.xpose.msra.mxu1 %v728_v1  ;;  %819 = vmatpush.xpose.msra.mxu2 %v744_v37 }
 0x12b   :  { %839 = vmatpush.xpose.msra.mxu3 %v760_v40 }
 0x12e   :  { %800 = vmatpush.xpose.msra.mxu1 %v727_v42  ;;  %820 = vmatpush.xpose.msra.mxu2 %v743_v49  ;;  %v707_v42 = vld [vmem:[#allocation6 + $0x8] sm:$0xff] }
 0x12f   :  { %840 = vmatpush.xpose.msra.mxu3 %v759_v50  ;;  %v706_v50 = vld [vmem:[#allocation6] sm:$0xff] }
 0x132   :  { %801 = vmatpush.xpose.msra.mxu1 %v726_v62  ;;  %821 = vmatpush.xpose.msra.mxu2 %v742_v4 }
 0x133   :  { %841 = vmatpush.xpose.msra.mxu3 %v758_v5 }
 0x191   :  { %v483_v20 = vpop.f32.mrf.mxu0  ;;  %v503_v21 = vpop.f32.mrf.mxu1 }
 0x198   :  { %v523_v8 = vpop.f32.mrf.mxu2  ;;  %v543_v9 = vpop.f32.mrf.mxu3 }
 0x199   :  { %v546_v15 = vrot.slane %v523_v8, 4  ;;  %v552_v17 = vrot.slane %v543_v9, 4 }
 0x19b   :  { %v547_v24 = vsel %vm238_vm1, %v546_v15, %v483_v20  ;;  %v553_v46 = vsel %vm238_vm1, %v552_v17, %v503_v21  ;;  %v709_v15 = vld [vmem:[#allocation6 + $0x18] sm:$0xff] }
 0x19c   :  { %v551_v25 = vperm.slane %v547_v24, %v1245_v55  ;;  %v557_v56 = vperm.slane %v553_v46, %v1245_v55  ;;  %v725_v17 = vld [vmem:[#allocation6 + $0x98] sm:$0xff]  ;;  %782 = vmatpush.xpose.msra.mxu0 %v709_v15 }
 0x19d   :  { %v741_v21 = vld [vmem:[#allocation6 + $0x118] sm:$0xff]  ;;  %802 = vmatpush.xpose.msra.mxu1 %v725_v17 }
 0x19e   :  { %v560_v33 = vrot.slane %v551_v25, 4  ;;  %v558_v47 = vrot.slane %v557_v56, 4  ;;  %v757_v24 = vld [vmem:[#allocation6 + $0x198] sm:$0xff]  ;;  %822 = vmatpush.xpose.msra.mxu2 %v741_v21 }
 0x19f   :  { %842 = vmatpush.xpose.msra.mxu3 %v757_v24 }
 0x1a0   :  { %v559_v34 = vsel %vm238_vm1, %v558_v47, %v551_v25  ;;  %v561_v35 = vsel %vm238_vm1, %v557_v56, %v560_v33  ;;  %v724_v33 = vld [vmem:[#allocation6 + $0x90] sm:$0xff]  ;;  %783 = vmatpush.xpose.msra.mxu0 %v708_v32 }
 0x1a1   :  { %v565_v38 = vperm.slane %v559_v34, %v1253_v11  ;;  %v569_v39 = vperm.slane %v561_v35, %v1253_v11  ;;  %v740_v35 = vld [vmem:[#allocation6 + $0x110] sm:$0xff]  ;;  %803 = vmatpush.xpose.msra.mxu1 %v724_v33 }
 0x1a2   :  { %823 = vmatpush.xpose.msra.mxu2 %v740_v35 }
 0x1a3   :  { %v570_v43 = vrot.slane %v565_v38, 4  ;;  %v572_v44 = vrot.slane %v569_v39, 4  ;;  %v574_v45 = vsel %vm73_vm2, %v565_v38, 0.0  ;;  %v576_v48 = vsel %vm1466_vm3, %v569_v39, 0.0  ;;  %843 = vmatpush.xpose.msra.mxu3 %v756_v36 }
 0x1a4   :  { %v578_v51 = vsel %vm85_vm0, %v574_v45, 0.0  ;;  %v592_v52 = vsel %vm85_vm0, %v576_v48, 0.0  ;;  %v755_v45 = vld [vmem:[#allocation6 + $0x188] sm:$0xff]  ;;  %784 = vmatpush.xpose.msra.mxu0 %v707_v42 }
 0x1a5   :  { %v571_v53 = vsel %vm238_vm1, 0.0, %v570_v43  ;;  %v573_v54 = vsel %vm238_vm1, 0.0, %v572_v44  ;;  %v579_v57 = vrot.slane %v578_v51, 4  ;;  %v593_v58 = vrot.slane %v592_v52, 4  ;;  %v723_v43 = vld [vmem:[#allocation6 + $0x88] sm:$0xff] }
 0x1a6   :  { %v575_v59 = vsel %vm1467_vm4, %v571_v53, 0.0  ;;  %v577_v60 = vsel %vm1468_vm5, %v573_v54, 0.0  ;;  %v739_v44 = vld [vmem:[#allocation6 + $0x108] sm:$0xff]  ;;  %804 = vmatpush.xpose.msra.mxu1 %v723_v43  ;;  %v754_v53 = vld [vmem:[#allocation6 + $0x180] sm:$0xff] }
 0x1a7   :  { %v580_v63 = vadd.f32 %v579_v57, %v578_v51  ;;  %v585_v0 = vsel %vm85_vm0, %v575_v59, 0.0  ;;  %v594_v2 = vadd.f32 %v593_v58, %v592_v52  ;;  %v599_v3 = vsel %vm85_vm0, %v577_v60, 0.0  ;;  %824 = vmatpush.xpose.msra.mxu2 %v739_v44  ;;  %844 = vmatpush.xpose.msra.mxu3 %v755_v45  ;;  %v722_v51 = vld [vmem:[#allocation6 + $0x80] sm:$0xff] }
 0x1a8   :  { %v586_v7 = vrot.slane %v585_v0, 4  ;;  %v600_v8 = vrot.slane %v599_v3, 4  ;;  %v738_v52 = vld [vmem:[#allocation6 + $0x100] sm:$0xff]  ;;  %785 = vmatpush.xpose.msra.mxu0 %v706_v50 }
 0x1a9   :  { %v581_v9 = vrot.slane %v580_v63, 2  ;;  %v595_v10 = vrot.slane %v594_v2, 2  ;;  %v1020_v45 = vld [vmem:[%s1454_s1 + $0x20] sm:$0xf] }
 0x1aa   :  { %v587_v13 = vadd.f32 %v586_v7, %v585_v0  ;;  %v601_v14 = vadd.f32 %v600_v8, %v599_v3  ;;  %805 = vmatpush.xpose.msra.mxu1 %v722_v51 }
 0x1ab   :  { %v582_v19 = vadd.f32 %v581_v9, %v580_v63  ;;  %v596_v20 = vadd.f32 %v595_v10, %v594_v2  ;;  %825 = vmatpush.xpose.msra.mxu2 %v738_v52  ;;  %845 = vmatpush.xpose.msra.mxu3 %v754_v53  ;;  %v1021_v53 = vld [vmem:[%s1454_s1 + $0x24] sm:$0xf] }
 0x1ac   :  { %v588_v46 = vrot.slane %v587_v13, 2  ;;  %v602_v25 = vrot.slane %v601_v14, 2 }
 0x1ad   :  { %v583_v56 = vrot.slane %v582_v19, 1  ;;  %v597_v29 = vrot.slane %v596_v20, 1 }
 0x1ae   :  { %v589_v30 = vadd.f32 %v588_v46, %v587_v13  ;;  %v603_v31 = vadd.f32 %v602_v25, %v601_v14 }
 0x1af   :  { %v584_v47 = vadd.f32 %v583_v56, %v582_v19  ;;  %v598_v34 = vadd.f32 %v597_v29, %v596_v20 }
 0x1b0   :  { %v590_v1 = vrot.slane %v589_v30, 1  ;;  %v604_v37 = vrot.slane %v603_v31, 1 }
 0x1b1   :  { %v1016_v38 = vmul.f32 -1.442695, %v584_v47  ;;  %v1018_v39 = vmul.f32 -1.442695, %v598_v34 }
 0x1b2   :  { %v591_v40 = vadd.f32 %v590_v1, %v589_v30  ;;  %v605_v41 = vadd.f32 %v604_v37, %v603_v31 }
 0x1b3   :  { %1051 = vpow2.f32 %v1016_v38 }
 0x1b4   :  { %v1017_v48 = vmul.f32 -1.442695, %v591_v40  ;;  %1053 = vpow2.f32 %v1018_v39  ;;  %v1019_v49 = vmul.f32 -1.442695, %v605_v41 }
 0x1b6   :  { %1055 = vpow2.f32 %v1017_v48 }
 0x1b7   :  { %1057 = vpow2.f32 %v1019_v49 }
 0x1b9   :  { %v1052_v54 = vpop.eup %1051 }
 0x1ba   :  { %v1054_v57 = vpop.eup %1053  ;;  %v618_v58 = vadd.f32 1.0, %v1052_v54 }
 0x1bb   :  { %v620_v59 = vadd.f32 1.0, %v1054_v57 }
 0x1bc   :  { %v1056_v60 = vpop.eup %1055  ;;  %1059 = vrcp.f32 %v618_v58  ;;  %v631_v0 = vand.u32 2147483647, %v618_v58  ;;  %v633_v3 = vand.u32 2147483648, %v618_v58  ;;  %vm627_vm9 = vweird.f32 %v618_v58 }
 0x1bd   :  { %v1058_v61 = vpop.eup %1057  ;;  %v619_v62 = vadd.f32 1.0, %v1056_v60  ;;  %1061 = vrcp.f32 %v620_v59  ;;  %vm657_vm10 = vweird.f32 %v620_v59  ;;  %v661_v13 = vand.u32 2147483647, %v620_v59 }
 0x1be   :  { %v621_v63 = vadd.f32 1.0, %v1058_v61  ;;  %vm1358_vm11 = vcmp.eq.f32.partialorder %v631_v0, 8.507059e+37  ;;  %v663_v14 = vand.u32 2147483648, %v620_v59  ;;  %v634_v17 = vor.u32 1.1754944e-38, %v633_v3 }
 0x1bf   :  { %1063 = vrcp.f32 %v619_v62  ;;  %vm642_vm12 = vweird.f32 %v619_v62  ;;  %v646_v24 = vand.u32 2147483647, %v619_v62  ;;  %v648_v56 = vand.u32 2147483648, %v619_v62 }
 0x1c0   :  { %1065 = vrcp.f32 %v621_v63  ;;  %vm1362_vm15 = vcmp.eq.f32.partialorder %v661_v13, 8.507059e+37  ;;  %v664_v32 = vor.u32 1.1754944e-38, %v663_v14  ;;  %v678_v35 = vand.u32 2147483648, %v621_v63 }
 0x1c1   :  { %v676_v37 = vand.u32 2147483647, %v621_v63  ;;  %vm672_vm4 = vweird.f32 %v621_v63  ;;  %v649_v41 = vor.u32 1.1754944e-38, %v648_v56 }
 0x1c2   :  { %v1060_v2 = vpop.eup %1059  ;;  %v679_v49 = vor.u32 1.1754944e-38, %v678_v35 }
 0x1c3   :  { %v1062_v4 = vpop.eup %1061  ;;  %v623_v5 = vmul.f32 %v1060_v2, %v618_v58  ;;  %vm628_vm13 = vweird.f32 %v1060_v2 }
 0x1c4   :  { %v653_v7 = vmul.f32 %v1062_v4, %v620_v59  ;;  %vm658_vm14 = vweird.f32 %v1062_v4  ;;  %vm629_vm6 = vmor %vm627_vm9, %vm628_vm13  ;;  %vm647_vm9 = vcmp.eq.f32.partialorder %v646_v24, 8.507059e+37  ;;  %v1023_v59 = vld [vmem:[%s1454_s1 + $0x2c] sm:$0xf]  ;;  %vm1474_vm13 = vcmp.eq.s32.totalorder %v1250_v6, 1 }
 0x1c5   :  { %v1064_v8 = vpop.eup %1063  ;;  %v624_v9 = vsub.f32 1.0, %v623_v5  ;;  %vm659_vm8 = vmor %vm657_vm10, %vm658_vm14  ;;  %vm1475_vm14 = vcmp.eq.s32.totalorder %v1250_v6, 3 }
 0x1c6   :  { %v1066_v15 = vpop.eup %1065  ;;  %v638_v19 = vmul.f32 %v1064_v8, %v619_v62  ;;  %v654_v20 = vsub.f32 1.0, %v653_v7  ;;  %vm643_vm7 = vweird.f32 %v1064_v8 }
 0x1c7   :  { %v625_v21 = vmul.f32 %v1060_v2, %v624_v9  ;;  %v668_v46 = vmul.f32 %v1066_v15, %v621_v63  ;;  %vm673_vm3 = vweird.f32 %v1066_v15  ;;  %vm644_vm5 = vmor %vm642_vm12, %vm643_vm7  ;;  %vm1473_vm12 = vcmp.eq.s32.totalorder %v1250_v6, 2 }
 0x1c8   :  { %v639_v25 = vsub.f32 1.0, %v638_v19  ;;  %v655_v29 = vmul.f32 %v1062_v4, %v654_v20  ;;  %vm674_vm10 = vmor %vm672_vm4, %vm673_vm3 }
 0x1c9   :  { %v626_v30 = vadd.f32 %v1060_v2, %v625_v21  ;;  %v669_v33 = vsub.f32 1.0, %v668_v46 }
 0x1ca   :  { %v640_v47 = vmul.f32 %v1064_v8, %v639_v25  ;;  %v656_v34 = vadd.f32 %v1062_v4, %v655_v29 }
 0x1cb   :  { %v630_v36 = vsel %vm629_vm6, %v1060_v2, %v626_v30  ;;  %v670_v1 = vmul.f32 %v1066_v15, %v669_v33 }
 0x1cc   :  { %v1370_v38 = vsel %vm1358_vm11, %v634_v17, %v630_v36  ;;  %v641_v39 = vadd.f32 %v1064_v8, %v640_v47  ;;  %v660_v40 = vsel %vm659_vm8, %v1062_v4, %v656_v34  ;;  %vm677_vm11 = vcmp.eq.f32.partialorder %v676_v37, 8.507059e+37 }
 0x1cd   :  { %v1375_v42 = vsel %vm1362_vm15, %v664_v32, %v660_v40  ;;  %v671_v43 = vadd.f32 %v1066_v15, %v670_v1  ;;  %v682_v44 = vmul.f32 %v1370_v38, %v1298_v18  ;;  %v1022_v18 = vld [vmem:[%s1454_s1 + $0x28] sm:$0xf] }
 0x1ce   :  { %v645_v48 = vsel %vm644_vm5, %v1064_v8, %v641_v39  ;;  %v684_v50 = vmul.f32 %v1375_v42, %v1305_v22 }
 0x1cf   :  { %v1384_v51 = vsel %vm647_vm9, %v649_v41, %v645_v48  ;;  %v675_v52 = vsel %vm674_vm10, %v1066_v15, %v671_v43  ;;  %v695_v58 = vmul.f32 %v1020_v45, %v682_v44 }
 0x1d0   :  { %v1392_v54 = vsel %vm677_vm11, %v679_v49, %v675_v52  ;;  %v683_v57 = vmul.f32 %v1384_v51, %v1319_v27  ;;  %v697_v61 = vmul.f32 %v1022_v18, %v684_v50 }
 0x1d1   :  { %v685_v22 = vmul.f32 %v1392_v54, %v1324_v28  ;;  %v699_v63 = vsel %vm85_vm0, %v695_v58, 0.0 }
 0x1d2   :  { %v696_v60 = vmul.f32 %v1021_v53, %v683_v57  ;;  %v702_v3 = vsel %vm85_vm0, %v697_v61, 0.0 }
 0x1d3   :  { %v698_v62 = vmul.f32 %v1023_v59, %v685_v22 }
 0x1d4   :  { %v700_v0 = vsel %vm85_vm0, %v696_v60, 0.0 }
 0x1d5   :  { %v701_v2 = vadd.f32 %v700_v0, %v699_v63  ;;  %v704_v27 = vsel %vm85_vm0, %v698_v62, 0.0 }
 0x1d7   :  { %v703_v4 = vadd.f32 %v702_v3, %v701_v2 }
 0x1d9   :  { %v705_v5 = vadd.f32 %v704_v27, %v703_v4 }
 0x1db   :  { %786 = vmatmul.f32.vlgmr.msra.gmra.mxu0 %v705_v5  ;;  %806 = vmatmul.f32.vlgmr.msra.gmra.mxu1 %v705_v5 }
 0x1dc   :  { %826 = vmatmul.f32.vlgmr.msra.gmra.mxu2 %v705_v5  ;;  %846 = vmatmul.f32.vlgmr.msra.gmra.mxu3 %v705_v5 }
 0x258   :  { %v787_v10 = vpop.f32.mrf.mxu0  ;;  %v807_v13 = vpop.f32.mrf.mxu1 }
 0x25f   :  { %v827_v28 = vpop.f32.mrf.mxu2  ;;  %v847_v7 = vpop.f32.mrf.mxu3 }
 0x260   :  { %v850_v8 = vrot.slane %v827_v28, 4  ;;  %v856_v9 = vrot.slane %v847_v7, 4 }
 0x262   :  { %v851_v14 = vsel %vm238_vm1, %v850_v8, %v787_v10  ;;  %v857_v15 = vsel %vm238_vm1, %v856_v9, %v807_v13 }
 0x263   :  { %v855_v17 = vperm.slane %v851_v14, %v1245_v55  ;;  %v861_v19 = vperm.slane %v857_v15, %v1245_v55 }
 0x265   :  { %v864_v20 = vrot.slane %v855_v17, 4  ;;  %v862_v21 = vrot.slane %v861_v19, 4 }
 0x267   :  { %v863_v24 = vsel %vm238_vm1, %v862_v21, %v855_v17  ;;  %v865_v46 = vsel %vm238_vm1, %v861_v19, %v864_v20 }
 0x268   :  { %v869_v25 = vperm.slane %v863_v24, %v1253_v11  ;;  %v873_v56 = vperm.slane %v865_v46, %v1253_v11  ;;  %v686_v24 = vmul.f32 %v1370_v38, %v1289_v12 }
 0x26a   :  { %v874_v29 = vrot.slane %v869_v25, 4  ;;  %v876_v30 = vrot.slane %v873_v56, 4  ;;  %v878_v31 = vsel %vm73_vm2, %v869_v25, 0.0  ;;  %v880_v32 = vsel %vm1473_vm12, %v873_v56, 0.0 }
 0x26b   :  { %v882_v55 = vsel %vm85_vm0, %v878_v31, 0.0  ;;  %v896_v33 = vsel %vm85_vm0, %v880_v32, 0.0  ;;  %v687_v25 = vmul.f32 %v1384_v51, %v1307_v23  ;;  %v688_v56 = vmul.f32 %v1375_v42, %v1294_v16 }
 0x26c   :  { %v875_v47 = vsel %vm238_vm1, 0.0, %v874_v29  ;;  %v877_v34 = vsel %vm238_vm1, 0.0, %v876_v30  ;;  %v883_v35 = vrot.slane %v882_v55, 4  ;;  %v897_v36 = vrot.slane %v896_v33, 4 }
 0x26d   :  { %v879_v11 = vsel %vm1474_vm13, %v875_v47, 0.0  ;;  %v881_v1 = vsel %vm1475_vm14, %v877_v34, 0.0  ;;  %v689_v29 = vmul.f32 %v1392_v54, %v1315_v26 }
 0x26e   :  { %v884_v37 = vadd.f32 %v883_v35, %v882_v55  ;;  %v889_v39 = vsel %vm85_vm0, %v879_v11, 0.0  ;;  %v898_v40 = vadd.f32 %v897_v36, %v896_v33  ;;  %v903_v41 = vsel %vm85_vm0, %v881_v1, 0.0 }
 0x26f   :  { %v890_v43 = vrot.slane %v889_v39, 4  ;;  %v904_v44 = vrot.slane %v903_v41, 4 }
 0x270   :  { %v885_v45 = vrot.slane %v884_v37, 2  ;;  %v899_v48 = vrot.slane %v898_v40, 2 }
 0x271   :  { %v891_v49 = vadd.f32 %v890_v43, %v889_v39  ;;  %v905_v50 = vadd.f32 %v904_v44, %v903_v41 }
 0x272   :  { %v886_v52 = vadd.f32 %v885_v45, %v884_v37  ;;  %v900_v53 = vadd.f32 %v899_v48, %v898_v40 }
 0x273   :  { %v892_v18 = vrot.slane %v891_v49, 2  ;;  %v906_v57 = vrot.slane %v905_v50, 2 }
 0x274   :  { %v887_v58 = vrot.slane %v886_v52, 1  ;;  %v901_v22 = vrot.slane %v900_v53, 1 }
 0x275   :  { %v893_v6 = vadd.f32 %v892_v18, %v891_v49  ;;  %v907_v59 = vadd.f32 %v906_v57, %v905_v50 }
 0x276   :  { %v888_v60 = vadd.f32 %v887_v58, %v886_v52  ;;  %v902_v61 = vadd.f32 %v901_v22, %v900_v53 }
 0x277   :  { %v894_v62 = vrot.slane %v893_v6, 1  ;;  %v908_v63 = vrot.slane %v907_v59, 1 }
 0x278   :  { %v1024_v0 = vmul.f32 -1.442695, %v888_v60  ;;  %v1026_v2 = vmul.f32 -1.442695, %v902_v61 }
 0x279   :  { %v895_v3 = vadd.f32 %v894_v62, %v893_v6  ;;  %v909_v4 = vadd.f32 %v908_v63, %v907_v59 }
 0x27a   :  { %1067 = vpow2.f32 %v1024_v0 }
 0x27b   :  { %v1025_v27 = vmul.f32 -1.442695, %v895_v3  ;;  %1069 = vpow2.f32 %v1026_v2  ;;  %v1027_v5 = vmul.f32 -1.442695, %v909_v4 }
 0x27d   :  { %1071 = vpow2.f32 %v1025_v27 }
 0x27e   :  { %1073 = vpow2.f32 %v1027_v5 }
 0x280   :  { %v1068_v28 = vpop.eup %1067 }
 0x281   :  { %v1070_v7 = vpop.eup %1069  ;;  %v922_v8 = vadd.f32 1.0, %v1068_v28 }
 0x282   :  { %v924_v9 = vadd.f32 1.0, %v1070_v7 }
 0x283   :  { %v1072_v10 = vpop.eup %1071  ;;  %1075 = vrcp.f32 %v922_v8  ;;  %v935_v19 = vand.u32 2147483647, %v922_v8  ;;  %v937_v20 = vand.u32 2147483648, %v922_v8  ;;  %vm931_vm0 = vweird.f32 %v922_v8 }
 0x284   :  { %v1074_v13 = vpop.eup %1073  ;;  %v923_v14 = vadd.f32 1.0, %v1072_v10  ;;  %1077 = vrcp.f32 %v924_v9  ;;  %vm961_vm1 = vweird.f32 %v924_v9  ;;  %v965_v55 = vand.u32 2147483647, %v924_v9 }
 0x285   :  { %v925_v15 = vadd.f32 1.0, %v1074_v13  ;;  %vm1435_vm2 = vcmp.eq.f32.partialorder %v935_v19, 8.507059e+37  ;;  %v938_v12 = vor.u32 1.1754944e-38, %v937_v20  ;;  %v967_v16 = vand.u32 2147483648, %v924_v9 }
 0x286   :  { %1079 = vrcp.f32 %v923_v14  ;;  %vm946_vm6 = vweird.f32 %v923_v14  ;;  %v950_v35 = vand.u32 2147483647, %v923_v14  ;;  %v952_v36 = vand.u32 2147483648, %v923_v14 }
 0x287   :  { %1081 = vrcp.f32 %v925_v15  ;;  %v982_v39 = vand.u32 2147483648, %v925_v15  ;;  %v980_v44 = vand.u32 2147483647, %v925_v15  ;;  %vm966_vm9 = vcmp.eq.f32.partialorder %v965_v55, 8.507059e+37 }
 0x288   :  { %v968_v49 = vor.u32 1.1754944e-38, %v967_v16  ;;  %v953_v52 = vor.u32 1.1754944e-38, %v952_v36  ;;  %vm976_vm11 = vweird.f32 %v925_v15  ;;  %vm951_vm12 = vcmp.eq.f32.partialorder %v950_v35, 8.507059e+37 }
 0x289   :  { %v1076_v17 = vpop.eup %1075  ;;  %v983_v58 = vor.u32 1.1754944e-38, %v982_v39  ;;  %vm981_vm14 = vcmp.eq.f32.partialorder %v980_v44, 8.507059e+37 }
 0x28a   :  { %v1078_v21 = vpop.eup %1077  ;;  %v927_v46 = vmul.f32 %v1076_v17, %v922_v8  ;;  %vm932_vm15 = vweird.f32 %v1076_v17 }
 0x28b   :  { %v957_v30 = vmul.f32 %v1078_v21, %v924_v9  ;;  %vm962_vm7 = vweird.f32 %v1078_v21  ;;  %vm933_vm8 = vmor %vm931_vm0, %vm932_vm15  ;;  %vm994_vm0 = vcmask 1041409  }
 0x28c   :  { %v1080_v31 = vpop.eup %1079  ;;  %v928_v32 = vsub.f32 1.0, %v927_v46  ;;  %vm1441_vm4 = vmor %vm961_vm1, %vm962_vm7  ;;  %vm996_vm1 = vcmask 1042434  }
 0x28d   :  { %v1082_v33 = vpop.eup %1081  ;;  %v942_v38 = vmul.f32 %v1080_v31, %v923_v14  ;;  %v958_v23 = vsub.f32 1.0, %v957_v30  ;;  %vm947_vm3 = vweird.f32 %v1080_v31 }
 0x28e   :  { %v929_v51 = vmul.f32 %v1076_v17, %v928_v32  ;;  %v972_v42 = vmul.f32 %v1082_v33, %v925_v15  ;;  %vm977_vm5 = vweird.f32 %v1082_v33  ;;  %vm948_vm10 = vmor %vm946_vm6, %vm947_vm3 }
 0x28f   :  { %v943_v34 = vsub.f32 1.0, %v942_v38  ;;  %v959_v26 = vmul.f32 %v1078_v21, %v958_v23  ;;  %vm978_vm13 = vmor %vm976_vm11, %vm977_vm5 }
 0x290   :  { %v930_v54 = vadd.f32 %v1076_v17, %v929_v51  ;;  %v973_v11 = vsub.f32 1.0, %v972_v42 }
 0x291   :  { %v944_v1 = vmul.f32 %v1080_v31, %v943_v34  ;;  %v960_v37 = vadd.f32 %v1078_v21, %v959_v26 }
 0x292   :  { %v934_v40 = vsel %vm933_vm8, %v1076_v17, %v930_v54  ;;  %v974_v43 = vmul.f32 %v1082_v33, %v973_v11 }
 0x293   :  { %v945_v45 = vadd.f32 %v1080_v31, %v944_v1  ;;  %v964_v48 = vsel %vm1441_vm4, %v1078_v21, %v960_v37  ;;  %v939_v50 = vsel %vm1435_vm2, %v938_v12, %v934_v40  ;;  %vm998_vm2 = vcmask 1043459  }
 0x294   :  { %v975_v53 = vadd.f32 %v1082_v33, %v974_v43  ;;  %v969_v57 = vsel %vm966_vm9, %v968_v49, %v964_v48  ;;  %v986_v60 = vmul.f32 %v939_v50, %v686_v24 }
 0x295   :  { %v949_v18 = vsel %vm948_vm10, %v1080_v31, %v945_v45  ;;  %v988_v62 = vmul.f32 %v969_v57, %v688_v56 }
 0x296   :  { %v954_v22 = vsel %vm951_vm12, %v953_v52, %v949_v18  ;;  %v979_v6 = vsel %vm978_vm13, %v1082_v33, %v975_v53 }
 0x297   :  { %v984_v59 = vsel %vm981_vm14, %v983_v58, %v979_v6  ;;  %v987_v61 = vmul.f32 %v954_v22, %v687_v25 }
 0x298   :  { %v989_v63 = vmul.f32 %v984_v59, %v689_v29 }
 0x299   :  { %v995_v0 = vsel %vm994_vm0, %v987_v61, %v986_v60 }
 0x29a   :  { %v997_v2 = vsel %vm996_vm1, %v988_v62, %v995_v0 }
 0x29b   :  { %v999_v3 = vsel %vm998_vm2, %v989_v63, %v997_v2 }
 0x29c   :  { %1001 = vst [vmem:[%s1458_s5] sm:$0xf] %v999_v3 }
 0x29d   :  { %1006 = vsyncpa [#allocation3], 1 }
 0x29e   :  { %1007 = vsyncpa [#allocation5], 1 }

</bundles_post_ra>
